<compile_context>
chip_gen: v7x
topology: tpu7x:2x2x1
jax: 0.10.0
libtpu: 0.0.40
codegen_flags: <defaults>
</compile_context>

<pallas_src>
import functools

import jax
import jax.numpy as jnp
from jax.experimental import pallas as pl
from jax.experimental.pallas import tpu as pltpu


# ------------------------- fused LSTM + MLP kernel ----------------------------
def make_fused_lstm_mlp_kernel(num_layers, T, B, H):
    """Builds a fused kernel: `num_layers` LSTM layers + relu-relu-linear MLP head.

    Kernel ref layout (inputs, then output, then scratch):
      x2d        : (B*T, D)   input, rows ordered b*T + t (batch-major flatten)
      per layer  : w_ih (D_in, 4H), w_hh (H, 4H), bias (1, 4H)   [PyTorch i,f,g,o order]
      h0, c0     : (L, B, H)
      fc1_w/b, fc2_w/b, fc3_w/b
      o_ref      : (B, C)
      proj_sc    : (T*B, 4H)  VMEM scratch, hoisted input projection of current layer
      seq_sc     : (T*B, H)   VMEM scratch, previous layer's hidden sequence
                              (rows ordered t*B + b), only when num_layers > 1
    """

    def kernel(*refs):
        idx = 0
        x_ref = refs[idx]; idx += 1
        layer_refs = []
        for _ in range(num_layers):
            layer_refs.append((refs[idx], refs[idx + 1], refs[idx + 2]))
            idx += 3
        h0_ref = refs[idx]; idx += 1
        c0_ref = refs[idx]; idx += 1
        fc1_w, fc1_b, fc2_w, fc2_b, fc3_w, fc3_b = refs[idx:idx + 6]; idx += 6
        o_ref = refs[idx]; idx += 1
        proj_sc = refs[idx]; idx += 1
        seq_sc = refs[idx] if num_layers > 1 else None

        last_h = None
        for layer in range(num_layers):
            wih_ref, whh_ref, b_ref = layer_refs[layer]
            last_layer = layer == num_layers - 1

            # ---- hoisted input projection: one matmul + one bias add per layer ----
            if layer == 0:
                inp = x_ref[...]                      # (B*T, D), rows b*T + t
            else:
                inp = seq_sc[...]                     # (T*B, H), rows t*B + b
            proj_sc[...] = (jnp.dot(inp, wih_ref[...],
                                    preferred_element_type=jnp.float32)
                            + b_ref[...])

            whh = whh_ref[...]                        # hoisted out of the time loop
            h = h0_ref[layer]                         # (B, H), carried in vregs
            c = c0_ref[layer]

            # ---- fully unrolled recurrence (T is static) ----
            for t in range(T):
                if layer == 0:
                    # batch rows at time t from the batch-major projection
                    xt = proj_sc[pl.ds(t, B, stride=T), :]
                else:
                    # time-major projection: contiguous block of B rows
                    xt = proj_sc[pl.ds(t * B, B), :]
                gates = xt + jnp.dot(h, whh, preferred_element_type=jnp.float32)
                i_g = jax.nn.sigmoid(gates[:, 0 * H:1 * H])
                f_g = jax.nn.sigmoid(gates[:, 1 * H:2 * H])
                g_g = jnp.tanh(gates[:, 2 * H:3 * H])
                o_g = jax.nn.sigmoid(gates[:, 3 * H:4 * H])
                c = f_g * c + i_g * g_g
                h = o_g * jnp.tanh(c)
                if not last_layer:
                    # feed the next layer (time-major rows); last layer skips stores
                    seq_sc[pl.ds(t * B, B), :] = h
            # TODO(synk): inter-layer dropout(0.2) is train-only; eval mode = identity.
            last_h = h                                # only t = T-1 of last layer used

        # ---- fused 3-layer MLP head on the final hidden state ----
        z = jnp.dot(last_h, fc1_w[...], preferred_element_type=jnp.float32) + fc1_b[...]
        z = jnp.maximum(z, 0.0)
        z = jnp.dot(z, fc2_w[...], preferred_element_type=jnp.float32) + fc2_b[...]
        z = jnp.maximum(z, 0.0)
        o_ref[...] = jnp.dot(z, fc3_w[...], preferred_element_type=jnp.float32) + fc3_b[...]

    return kernel


# ------------------------------ Parameter setup --------------------------------
def init_params(key, input_size, hidden_size, num_layers, num_classes):
    params = {}
    k = 1.0 / jnp.sqrt(hidden_size)

    def uni(key, shape, lim):
        return jax.random.uniform(key, shape, jnp.float32, minval=-lim, maxval=lim)

    keys = jax.random.split(key, num_layers * 4 + 6)
    ki = 0
    for layer in range(num_layers):
        d_in = input_size if layer == 0 else hidden_size
        # PyTorch stores weight_ih: (4H, d_in), weight_hh: (4H, H); we keep transposes.
        params[f"w_ih_{layer}"] = uni(keys[ki], (d_in, 4 * hidden_size), k); ki += 1
        params[f"w_hh_{layer}"] = uni(keys[ki], (hidden_size, 4 * hidden_size), k); ki += 1
        b_ih = uni(keys[ki], (4 * hidden_size,), k); ki += 1
        b_hh = uni(keys[ki], (4 * hidden_size,), k); ki += 1
        params[f"b_{layer}"] = (b_ih + b_hh).reshape(1, 4 * hidden_size)

    half = hidden_size // 2
    kf = 1.0 / jnp.sqrt(hidden_size)
    params["fc1_w"] = uni(keys[ki], (hidden_size, half), kf); ki += 1
    params["fc1_b"] = uni(keys[ki], (1, half), kf); ki += 1
    kf = 1.0 / jnp.sqrt(half)
    params["fc2_w"] = uni(keys[ki], (half, half), kf); ki += 1
    params["fc2_b"] = uni(keys[ki], (1, half), kf); ki += 1
    params["fc3_w"] = uni(keys[ki], (half, num_classes), kf); ki += 1
    params["fc3_b"] = uni(keys[ki], (1, num_classes), kf); ki += 1
    return params


# --------------------------------- Forward -------------------------------------
@functools.partial(jax.jit, static_argnames=("num_layers",))
def forward(x, params, h0, c0, *, num_layers):
    """x: (B, T, input_size). Returns (B, num_classes)."""
    # x.squeeze() in the reference is a no-op for a dense (B, T, D) input; x.float():
    x = x.astype(jnp.float32)
    B, T, _ = x.shape
    H = h0.shape[-1]
    C = params["fc3_w"].shape[-1]

    # Metadata-only reshape (no HBM pass / no transpose); rows ordered b*T + t.
    x2d = x.reshape(B * T, x.shape[-1])

    inputs = [x2d]
    for layer in range(num_layers):
        inputs += [params[f"w_ih_{layer}"], params[f"w_hh_{layer}"], params[f"b_{layer}"]]
    inputs += [h0, c0,
               params["fc1_w"], params["fc1_b"],
               params["fc2_w"], params["fc2_b"],
               params["fc3_w"], params["fc3_b"]]

    scratch = [pltpu.VMEM((T * B, 4 * H), jnp.float32)]
    if num_layers > 1:
        scratch.append(pltpu.VMEM((T * B, H), jnp.float32))

    kernel = make_fused_lstm_mlp_kernel(num_layers, T, B, H)
    return pl.pallas_call(
        kernel,
        out_shape=jax.ShapeDtypeStruct((B, C), jnp.float32),
        in_specs=[pl.BlockSpec(memory_space=pltpu.MemorySpace.VMEM)] * len(inputs),
        out_specs=pl.BlockSpec(memory_space=pltpu.MemorySpace.VMEM),
        scratch_shapes=scratch,
    )(*inputs)


if __name__ == "__main__":
    input_size = 16
    hidden_size = 32
    num_layers = 2
    num_classes = 5
    batch = 2
    seq = 8

    root = jax.random.PRNGKey(0)
    k_x, k_p, k_h, k_c = jax.random.split(root, 4)

    x = jax.random.normal(k_x, (batch, seq, input_size), jnp.float32)
    params = init_params(k_p, input_size, hidden_size, num_layers, num_classes)
    # Deterministic stand-in for torch.manual_seed(42); torch.rand(...) in [0, 1).
    h0 = jax.random.uniform(k_h, (num_layers, batch, hidden_size), jnp.float32)
    c0 = jax.random.uniform(k_c, (num_layers, batch, hidden_size), jnp.float32)

    out = forward(x, params, h0, c0, num_layers=num_layers)
    jax.block_until_ready(out)
    assert out.shape == (batch, num_classes), out.shape
    print("KERNEL_OK")
</pallas_src>

<mosaic_0001>
module attributes {stable_mosaic.version = 11 : i64} {
  func.func @kernel(%arg0: memref<16x16xf32, #tpu.memory_space<vmem>>, %arg1: memref<16x128xf32, #tpu.memory_space<vmem>>, %arg2: memref<32x128xf32, #tpu.memory_space<vmem>>, %arg3: memref<1x128xf32, #tpu.memory_space<vmem>>, %arg4: memref<32x128xf32, #tpu.memory_space<vmem>>, %arg5: memref<32x128xf32, #tpu.memory_space<vmem>>, %arg6: memref<1x128xf32, #tpu.memory_space<vmem>>, %arg7: memref<2x2x32xf32, #tpu.memory_space<vmem>>, %arg8: memref<2x2x32xf32, #tpu.memory_space<vmem>>, %arg9: memref<32x16xf32, #tpu.memory_space<vmem>>, %arg10: memref<1x16xf32, #tpu.memory_space<vmem>>, %arg11: memref<16x16xf32, #tpu.memory_space<vmem>>, %arg12: memref<1x16xf32, #tpu.memory_space<vmem>>, %arg13: memref<16x5xf32, #tpu.memory_space<vmem>>, %arg14: memref<1x5xf32, #tpu.memory_space<vmem>>, %arg15: memref<2x5xf32, #tpu.memory_space<vmem>>, %arg16: memref<16x128xf32, #tpu.memory_space<vmem>>, %arg17: memref<16x32xf32, #tpu.memory_space<vmem>>) attributes {dimension_semantics = [], scalar_prefetch = 0 : i64, scratch_operands = 2 : i64, tpu.core_type = #tpu.core_type<tc>} {
    %c0 = arith.constant 0 : index
    %c0_0 = arith.constant 0 : index
    %0 = vector.load %arg0[%c0, %c0_0] : memref<16x16xf32, #tpu.memory_space<vmem>>, vector<16x16xf32>
    %c0_1 = arith.constant 0 : index
    %c0_2 = arith.constant 0 : index
    %1 = vector.load %arg1[%c0_1, %c0_2] : memref<16x128xf32, #tpu.memory_space<vmem>>, vector<16x128xf32>
    %cst = arith.constant dense<0.000000e+00> : vector<16x128xf32>
    %2 = tpu.matmul %0, %1, %cst {dimension_numbers = #tpu.dot_dimension_numbers<[1], [0], [0], [1], [0, 0, 1, 1], [], []>} : vector<16x16xf32>, vector<16x128xf32>, vector<16x128xf32> -> vector<16x128xf32>
    %c0_3 = arith.constant 0 : index
    %c0_4 = arith.constant 0 : index
    %3 = vector.load %arg3[%c0_3, %c0_4] : memref<1x128xf32, #tpu.memory_space<vmem>>, vector<1x128xf32>
    %4 = vector.broadcast %3 : vector<1x128xf32> to vector<16x128xf32>
    %5 = arith.addf %2, %4 : vector<16x128xf32>
    %c0_5 = arith.constant 0 : index
    %c0_6 = arith.constant 0 : index
    %6 = vector.load %arg16[%c0_5, %c0_6] : memref<16x128xf32, #tpu.memory_space<vmem>>, vector<16x128xf32>
    tpu.vector_store %arg16[%c0_5, %c0_6], %5 {strides = array<i32>} : memref<16x128xf32, #tpu.memory_space<vmem>>, vector<16x128xf32>,
    %c0_7 = arith.constant 0 : index
    %c0_8 = arith.constant 0 : index
    %7 = vector.load %arg2[%c0_7, %c0_8] : memref<32x128xf32, #tpu.memory_space<vmem>>, vector<32x128xf32>
    %c0_9 = arith.constant 0 : index
    %c0_10 = arith.constant 0 : index
    %c0_11 = arith.constant 0 : index
    %8 = vector.load %arg7[%c0_9, %c0_10, %c0_11] : memref<2x2x32xf32, #tpu.memory_space<vmem>>, vector<1x2x32xf32>
    %9 = vector.shape_cast %8 : vector<1x2x32xf32> to vector<2x32xf32>
    %c0_12 = arith.constant 0 : index
    %c0_13 = arith.constant 0 : index
    %c0_14 = arith.constant 0 : index
    %10 = vector.load %arg8[%c0_12, %c0_13, %c0_14] : memref<2x2x32xf32, #tpu.memory_space<vmem>>, vector<1x2x32xf32>
    %11 = vector.shape_cast %10 : vector<1x2x32xf32> to vector<2x32xf32>
    %c0_15 = arith.constant 0 : index
    %c0_16 = arith.constant 0 : index
    %12 = tpu.strided_load %arg16[%c0_15, %c0_16] {strides = array<i32: 8, 1>} : memref<16x128xf32, #tpu.memory_space<vmem>>, vector<2x128xf32>
    %cst_17 = arith.constant dense<0.000000e+00> : vector<2x128xf32>
    %13 = tpu.matmul %9, %7, %cst_17 {dimension_numbers = #tpu.dot_dimension_numbers<[1], [0], [0], [1], [0, 0, 1, 1], [], []>} : vector<2x32xf32>, vector<32x128xf32>, vector<2x128xf32> -> vector<2x128xf32>
    %14 = arith.addf %12, %13 : vector<2x128xf32>
    %15 = vector.extract_strided_slice %14 {offsets = [0, 0], sizes = [2, 32], strides = [1, 1]} : vector<2x128xf32> to vector<2x32xf32>
    %16 = arith.negf %15 : vector<2x32xf32>
    %17 = math.exp %16 : vector<2x32xf32>
    %cst_18 = arith.constant 1.000000e+00 : f32
    %18 = vector.broadcast %cst_18 : f32 to vector<2x32xf32>
    %19 = arith.addf %18, %17 : vector<2x32xf32>
    %20 = arith.divf %18, %19 : vector<2x32xf32>
    %21 = vector.extract_strided_slice %14 {offsets = [0, 32], sizes = [2, 32], strides = [1, 1]} : vector<2x128xf32> to vector<2x32xf32>
    %22 = arith.negf %21 : vector<2x32xf32>
    %23 = math.exp %22 : vector<2x32xf32>
    %cst_19 = arith.constant 1.000000e+00 : f32
    %24 = vector.broadcast %cst_19 : f32 to vector<2x32xf32>
    %25 = arith.addf %24, %23 : vector<2x32xf32>
    %26 = arith.divf %24, %25 : vector<2x32xf32>
    %27 = vector.extract_strided_slice %14 {offsets = [0, 64], sizes = [2, 32], strides = [1, 1]} : vector<2x128xf32> to vector<2x32xf32>
    %28 = math.tanh %27 : vector<2x32xf32>
    %29 = vector.extract_strided_slice %14 {offsets = [0, 96], sizes = [2, 32], strides = [1, 1]} : vector<2x128xf32> to vector<2x32xf32>
    %30 = arith.negf %29 : vector<2x32xf32>
    %31 = math.exp %30 : vector<2x32xf32>
    %cst_20 = arith.constant 1.000000e+00 : f32
    %32 = vector.broadcast %cst_20 : f32 to vector<2x32xf32>
    %33 = arith.addf %32, %31 : vector<2x32xf32>
    %34 = arith.divf %32, %33 : vector<2x32xf32>
    %35 = arith.mulf %26, %11 : vector<2x32xf32>
    %36 = arith.mulf %20, %28 : vector<2x32xf32>
    %37 = arith.addf %35, %36 : vector<2x32xf32>
    %38 = math.tanh %37 : vector<2x32xf32>
    %39 = arith.mulf %34, %38 : vector<2x32xf32>
    %c0_21 = arith.constant 0 : index
    %c0_22 = arith.constant 0 : index
    %40 = vector.load %arg17[%c0_21, %c0_22] : memref<16x32xf32, #tpu.memory_space<vmem>>, vector<2x32xf32>
    tpu.vector_store %arg17[%c0_21, %c0_22], %39 {strides = array<i32>} : memref<16x32xf32, #tpu.memory_space<vmem>>, vector<2x32xf32>,
    %c1 = arith.constant 1 : index
    %c0_23 = arith.constant 0 : index
    %41 = tpu.strided_load %arg16[%c1, %c0_23] {strides = array<i32: 8, 1>} : memref<16x128xf32, #tpu.memory_space<vmem>>, vector<2x128xf32>
    %cst_24 = arith.constant dense<0.000000e+00> : vector<2x128xf32>
    %42 = tpu.matmul %39, %7, %cst_24 {dimension_numbers = #tpu.dot_dimension_numbers<[1], [0], [0], [1], [0, 0, 1, 1], [], []>} : vector<2x32xf32>, vector<32x128xf32>, vector<2x128xf32> -> vector<2x128xf32>
    %43 = arith.addf %41, %42 : vector<2x128xf32>
    %44 = vector.extract_strided_slice %43 {offsets = [0, 0], sizes = [2, 32], strides = [1, 1]} : vector<2x128xf32> to vector<2x32xf32>
    %45 = arith.negf %44 : vector<2x32xf32>
    %46 = math.exp %45 : vector<2x32xf32>
    %cst_25 = arith.constant 1.000000e+00 : f32
    %47 = vector.broadcast %cst_25 : f32 to vector<2x32xf32>
    %48 = arith.addf %47, %46 : vector<2x32xf32>
    %49 = arith.divf %47, %48 : vector<2x32xf32>
    %50 = vector.extract_strided_slice %43 {offsets = [0, 32], sizes = [2, 32], strides = [1, 1]} : vector<2x128xf32> to vector<2x32xf32>
    %51 = arith.negf %50 : vector<2x32xf32>
    %52 = math.exp %51 : vector<2x32xf32>
    %cst_26 = arith.constant 1.000000e+00 : f32
    %53 = vector.broadcast %cst_26 : f32 to vector<2x32xf32>
    %54 = arith.addf %53, %52 : vector<2x32xf32>
    %55 = arith.divf %53, %54 : vector<2x32xf32>
    %56 = vector.extract_strided_slice %43 {offsets = [0, 64], sizes = [2, 32], strides = [1, 1]} : vector<2x128xf32> to vector<2x32xf32>
    %57 = math.tanh %56 : vector<2x32xf32>
    %58 = vector.extract_strided_slice %43 {offsets = [0, 96], sizes = [2, 32], strides = [1, 1]} : vector<2x128xf32> to vector<2x32xf32>
    %59 = arith.negf %58 : vector<2x32xf32>
    %60 = math.exp %59 : vector<2x32xf32>
    %cst_27 = arith.constant 1.000000e+00 : f32
    %61 = vector.broadcast %cst_27 : f32 to vector<2x32xf32>
    %62 = arith.addf %61, %60 : vector<2x32xf32>
    %63 = arith.divf %61, %62 : vector<2x32xf32>
    %64 = arith.mulf %55, %37 : vector<2x32xf32>
    %65 = arith.mulf %49, %57 : vector<2x32xf32>
    %66 = arith.addf %64, %65 : vector<2x32xf32>
    %67 = math.tanh %66 : vector<2x32xf32>
    %68 = arith.mulf %63, %67 : vector<2x32xf32>
    %c2 = arith.constant 2 : index
    %c0_28 = arith.constant 0 : index
    %69 = vector.load %arg17[%c2, %c0_28] : memref<16x32xf32, #tpu.memory_space<vmem>>, vector<2x32xf32>
    tpu.vector_store %arg17[%c2, %c0_28], %68 {strides = array<i32>} : memref<16x32xf32, #tpu.memory_space<vmem>>, vector<2x32xf32>,
    %c2_29 = arith.constant 2 : index
    %c0_30 = arith.constant 0 : index
    %70 = tpu.strided_load %arg16[%c2_29, %c0_30] {strides = array<i32: 8, 1>} : memref<16x128xf32, #tpu.memory_space<vmem>>, vector<2x128xf32>
    %cst_31 = arith.constant dense<0.000000e+00> : vector<2x128xf32>
    %71 = tpu.matmul %68, %7, %cst_31 {dimension_numbers = #tpu.dot_dimension_numbers<[1], [0], [0], [1], [0, 0, 1, 1], [], []>} : vector<2x32xf32>, vector<32x128xf32>, vector<2x128xf32> -> vector<2x128xf32>
    %72 = arith.addf %70, %71 : vector<2x128xf32>
    %73 = vector.extract_strided_slice %72 {offsets = [0, 0], sizes = [2, 32], strides = [1, 1]} : vector<2x128xf32> to vector<2x32xf32>
    %74 = arith.negf %73 : vector<2x32xf32>
    %75 = math.exp %74 : vector<2x32xf32>
    %cst_32 = arith.constant 1.000000e+00 : f32
    %76 = vector.broadcast %cst_32 : f32 to vector<2x32xf32>
    %77 = arith.addf %76, %75 : vector<2x32xf32>
    %78 = arith.divf %76, %77 : vector<2x32xf32>
    %79 = vector.extract_strided_slice %72 {offsets = [0, 32], sizes = [2, 32], strides = [1, 1]} : vector<2x128xf32> to vector<2x32xf32>
    %80 = arith.negf %79 : vector<2x32xf32>
    %81 = math.exp %80 : vector<2x32xf32>
    %cst_33 = arith.constant 1.000000e+00 : f32
    %82 = vector.broadcast %cst_33 : f32 to vector<2x32xf32>
    %83 = arith.addf %82, %81 : vector<2x32xf32>
    %84 = arith.divf %82, %83 : vector<2x32xf32>
    %85 = vector.extract_strided_slice %72 {offsets = [0, 64], sizes = [2, 32], strides = [1, 1]} : vector<2x128xf32> to vector<2x32xf32>
    %86 = math.tanh %85 : vector<2x32xf32>
    %87 = vector.extract_strided_slice %72 {offsets = [0, 96], sizes = [2, 32], strides = [1, 1]} : vector<2x128xf32> to vector<2x32xf32>
    %88 = arith.negf %87 : vector<2x32xf32>
    %89 = math.exp %88 : vector<2x32xf32>
    %cst_34 = arith.constant 1.000000e+00 : f32
    %90 = vector.broadcast %cst_34 : f32 to vector<2x32xf32>
    %91 = arith.addf %90, %89 : vector<2x32xf32>
    %92 = arith.divf %90, %91 : vector<2x32xf32>
    %93 = arith.mulf %84, %66 : vector<2x32xf32>
    %94 = arith.mulf %78, %86 : vector<2x32xf32>
    %95 = arith.addf %93, %94 : vector<2x32xf32>
    %96 = math.tanh %95 : vector<2x32xf32>
    %97 = arith.mulf %92, %96 : vector<2x32xf32>
    %c4 = arith.constant 4 : index
    %c0_35 = arith.constant 0 : index
    %98 = vector.load %arg17[%c4, %c0_35] : memref<16x32xf32, #tpu.memory_space<vmem>>, vector<2x32xf32>
    tpu.vector_store %arg17[%c4, %c0_35], %97 {strides = array<i32>} : memref<16x32xf32, #tpu.memory_space<vmem>>, vector<2x32xf32>,
    %c3 = arith.constant 3 : index
    %c0_36 = arith.constant 0 : index
    %99 = tpu.strided_load %arg16[%c3, %c0_36] {strides = array<i32: 8, 1>} : memref<16x128xf32, #tpu.memory_space<vmem>>, vector<2x128xf32>
    %cst_37 = arith.constant dense<0.000000e+00> : vector<2x128xf32>
    %100 = tpu.matmul %97, %7, %cst_37 {dimension_numbers = #tpu.dot_dimension_numbers<[1], [0], [0], [1], [0, 0, 1, 1], [], []>} : vector<2x32xf32>, vector<32x128xf32>, vector<2x128xf32> -> vector<2x128xf32>
    %101 = arith.addf %99, %100 : vector<2x128xf32>
    %102 = vector.extract_strided_slice %101 {offsets = [0, 0], sizes = [2, 32], strides = [1, 1]} : vector<2x128xf32> to vector<2x32xf32>
    %103 = arith.negf %102 : vector<2x32xf32>
    %104 = math.exp %103 : vector<2x32xf32>
    %cst_38 = arith.constant 1.000000e+00 : f32
    %105 = vector.broadcast %cst_38 : f32 to vector<2x32xf32>
    %106 = arith.addf %105, %104 : vector<2x32xf32>
    %107 = arith.divf %105, %106 : vector<2x32xf32>
    %108 = vector.extract_strided_slice %101 {offsets = [0, 32], sizes = [2, 32], strides = [1, 1]} : vector<2x128xf32> to vector<2x32xf32>
    %109 = arith.negf %108 : vector<2x32xf32>
    %110 = math.exp %109 : vector<2x32xf32>
    %cst_39 = arith.constant 1.000000e+00 : f32
    %111 = vector.broadcast %cst_39 : f32 to vector<2x32xf32>
    %112 = arith.addf %111, %110 : vector<2x32xf32>
    %113 = arith.divf %111, %112 : vector<2x32xf32>
    %114 = vector.extract_strided_slice %101 {offsets = [0, 64], sizes = [2, 32], strides = [1, 1]} : vector<2x128xf32> to vector<2x32xf32>
    %115 = math.tanh %114 : vector<2x32xf32>
    %116 = vector.extract_strided_slice %101 {offsets = [0, 96], sizes = [2, 32], strides = [1, 1]} : vector<2x128xf32> to vector<2x32xf32>
    %117 = arith.negf %116 : vector<2x32xf32>
    %118 = math.exp %117 : vector<2x32xf32>
    %cst_40 = arith.constant 1.000000e+00 : f32
    %119 = vector.broadcast %cst_40 : f32 to vector<2x32xf32>
    %120 = arith.addf %119, %118 : vector<2x32xf32>
    %121 = arith.divf %119, %120 : vector<2x32xf32>
    %122 = arith.mulf %113, %95 : vector<2x32xf32>
    %123 = arith.mulf %107, %115 : vector<2x32xf32>
    %124 = arith.addf %122, %123 : vector<2x32xf32>
    %125 = math.tanh %124 : vector<2x32xf32>
    %126 = arith.mulf %121, %125 : vector<2x32xf32>
    %c6 = arith.constant 6 : index
    %c0_41 = arith.constant 0 : index
    %127 = vector.load %arg17[%c6, %c0_41] : memref<16x32xf32, #tpu.memory_space<vmem>>, vector<2x32xf32>
    tpu.vector_store %arg17[%c6, %c0_41], %126 {strides = array<i32>} : memref<16x32xf32, #tpu.memory_space<vmem>>, vector<2x32xf32>,
    %c4_42 = arith.constant 4 : index
    %c0_43 = arith.constant 0 : index
    %128 = tpu.strided_load %arg16[%c4_42, %c0_43] {strides = array<i32: 8, 1>} : memref<16x128xf32, #tpu.memory_space<vmem>>, vector<2x128xf32>
    %cst_44 = arith.constant dense<0.000000e+00> : vector<2x128xf32>
    %129 = tpu.matmul %126, %7, %cst_44 {dimension_numbers = #tpu.dot_dimension_numbers<[1], [0], [0], [1], [0, 0, 1, 1], [], []>} : vector<2x32xf32>, vector<32x128xf32>, vector<2x128xf32> -> vector<2x128xf32>
    %130 = arith.addf %128, %129 : vector<2x128xf32>
    %131 = vector.extract_strided_slice %130 {offsets = [0, 0], sizes = [2, 32], strides = [1, 1]} : vector<2x128xf32> to vector<2x32xf32>
    %132 = arith.negf %131 : vector<2x32xf32>
    %133 = math.exp %132 : vector<2x32xf32>
    %cst_45 = arith.constant 1.000000e+00 : f32
    %134 = vector.broadcast %cst_45 : f32 to vector<2x32xf32>
    %135 = arith.addf %134, %133 : vector<2x32xf32>
    %136 = arith.divf %134, %135 : vector<2x32xf32>
    %137 = vector.extract_strided_slice %130 {offsets = [0, 32], sizes = [2, 32], strides = [1, 1]} : vector<2x128xf32> to vector<2x32xf32>
    %138 = arith.negf %137 : vector<2x32xf32>
    %139 = math.exp %138 : vector<2x32xf32>
    %cst_46 = arith.constant 1.000000e+00 : f32
    %140 = vector.broadcast %cst_46 : f32 to vector<2x32xf32>
    %141 = arith.addf %140, %139 : vector<2x32xf32>
    %142 = arith.divf %140, %141 : vector<2x32xf32>
    %143 = vector.extract_strided_slice %130 {offsets = [0, 64], sizes = [2, 32], strides = [1, 1]} : vector<2x128xf32> to vector<2x32xf32>
    %144 = math.tanh %143 : vector<2x32xf32>
    %145 = vector.extract_strided_slice %130 {offsets = [0, 96], sizes = [2, 32], strides = [1, 1]} : vector<2x128xf32> to vector<2x32xf32>
    %146 = arith.negf %145 : vector<2x32xf32>
    %147 = math.exp %146 : vector<2x32xf32>
    %cst_47 = arith.constant 1.000000e+00 : f32
    %148 = vector.broadcast %cst_47 : f32 to vector<2x32xf32>
    %149 = arith.addf %148, %147 : vector<2x32xf32>
    %150 = arith.divf %148, %149 : vector<2x32xf32>
    %151 = arith.mulf %142, %124 : vector<2x32xf32>
    %152 = arith.mulf %136, %144 : vector<2x32xf32>
    %153 = arith.addf %151, %152 : vector<2x32xf32>
    %154 = math.tanh %153 : vector<2x32xf32>
    %155 = arith.mulf %150, %154 : vector<2x32xf32>
    %c8 = arith.constant 8 : index
    %c0_48 = arith.constant 0 : index
    %156 = vector.load %arg17[%c8, %c0_48] : memref<16x32xf32, #tpu.memory_space<vmem>>, vector<2x32xf32>
    tpu.vector_store %arg17[%c8, %c0_48], %155 {strides = array<i32>} : memref<16x32xf32, #tpu.memory_space<vmem>>, vector<2x32xf32>,
    %c5 = arith.constant 5 : index
    %c0_49 = arith.constant 0 : index
    %157 = tpu.strided_load %arg16[%c5, %c0_49] {strides = array<i32: 8, 1>} : memref<16x128xf32, #tpu.memory_space<vmem>>, vector<2x128xf32>
    %cst_50 = arith.constant dense<0.000000e+00> : vector<2x128xf32>
    %158 = tpu.matmul %155, %7, %cst_50 {dimension_numbers = #tpu.dot_dimension_numbers<[1], [0], [0], [1], [0, 0, 1, 1], [], []>} : vector<2x32xf32>, vector<32x128xf32>, vector<2x128xf32> -> vector<2x128xf32>
    %159 = arith.addf %157, %158 : vector<2x128xf32>
    %160 = vector.extract_strided_slice %159 {offsets = [0, 0], sizes = [2, 32], strides = [1, 1]} : vector<2x128xf32> to vector<2x32xf32>
    %161 = arith.negf %160 : vector<2x32xf32>
    %162 = math.exp %161 : vector<2x32xf32>
    %cst_51 = arith.constant 1.000000e+00 : f32
    %163 = vector.broadcast %cst_51 : f32 to vector<2x32xf32>
    %164 = arith.addf %163, %162 : vector<2x32xf32>
    %165 = arith.divf %163, %164 : vector<2x32xf32>
    %166 = vector.extract_strided_slice %159 {offsets = [0, 32], sizes = [2, 32], strides = [1, 1]} : vector<2x128xf32> to vector<2x32xf32>
    %167 = arith.negf %166 : vector<2x32xf32>
    %168 = math.exp %167 : vector<2x32xf32>
    %cst_52 = arith.constant 1.000000e+00 : f32
    %169 = vector.broadcast %cst_52 : f32 to vector<2x32xf32>
    %170 = arith.addf %169, %168 : vector<2x32xf32>
    %171 = arith.divf %169, %170 : vector<2x32xf32>
    %172 = vector.extract_strided_slice %159 {offsets = [0, 64], sizes = [2, 32], strides = [1, 1]} : vector<2x128xf32> to vector<2x32xf32>
    %173 = math.tanh %172 : vector<2x32xf32>
    %174 = vector.extract_strided_slice %159 {offsets = [0, 96], sizes = [2, 32], strides = [1, 1]} : vector<2x128xf32> to vector<2x32xf32>
    %175 = arith.negf %174 : vector<2x32xf32>
    %176 = math.exp %175 : vector<2x32xf32>
    %cst_53 = arith.constant 1.000000e+00 : f32
    %177 = vector.broadcast %cst_53 : f32 to vector<2x32xf32>
    %178 = arith.addf %177, %176 : vector<2x32xf32>
    %179 = arith.divf %177, %178 : vector<2x32xf32>
    %180 = arith.mulf %171, %153 : vector<2x32xf32>
    %181 = arith.mulf %165, %173 : vector<2x32xf32>
    %182 = arith.addf %180, %181 : vector<2x32xf32>
    %183 = math.tanh %182 : vector<2x32xf32>
    %184 = arith.mulf %179, %183 : vector<2x32xf32>
    %c10 = arith.constant 10 : index
    %c0_54 = arith.constant 0 : index
    %185 = vector.load %arg17[%c10, %c0_54] : memref<16x32xf32, #tpu.memory_space<vmem>>, vector<2x32xf32>
    tpu.vector_store %arg17[%c10, %c0_54], %184 {strides = array<i32>} : memref<16x32xf32, #tpu.memory_space<vmem>>, vector<2x32xf32>,
    %c6_55 = arith.constant 6 : index
    %c0_56 = arith.constant 0 : index
    %186 = tpu.strided_load %arg16[%c6_55, %c0_56] {strides = array<i32: 8, 1>} : memref<16x128xf32, #tpu.memory_space<vmem>>, vector<2x128xf32>
    %cst_57 = arith.constant dense<0.000000e+00> : vector<2x128xf32>
    %187 = tpu.matmul %184, %7, %cst_57 {dimension_numbers = #tpu.dot_dimension_numbers<[1], [0], [0], [1], [0, 0, 1, 1], [], []>} : vector<2x32xf32>, vector<32x128xf32>, vector<2x128xf32> -> vector<2x128xf32>
    %188 = arith.addf %186, %187 : vector<2x128xf32>
    %189 = vector.extract_strided_slice %188 {offsets = [0, 0], sizes = [2, 32], strides = [1, 1]} : vector<2x128xf32> to vector<2x32xf32>
    %190 = arith.negf %189 : vector<2x32xf32>
    %191 = math.exp %190 : vector<2x32xf32>
    %cst_58 = arith.constant 1.000000e+00 : f32
    %192 = vector.broadcast %cst_58 : f32 to vector<2x32xf32>
    %193 = arith.addf %192, %191 : vector<2x32xf32>
    %194 = arith.divf %192, %193 : vector<2x32xf32>
    %195 = vector.extract_strided_slice %188 {offsets = [0, 32], sizes = [2, 32], strides = [1, 1]} : vector<2x128xf32> to vector<2x32xf32>
    %196 = arith.negf %195 : vector<2x32xf32>
    %197 = math.exp %196 : vector<2x32xf32>
    %cst_59 = arith.constant 1.000000e+00 : f32
    %198 = vector.broadcast %cst_59 : f32 to vector<2x32xf32>
    %199 = arith.addf %198, %197 : vector<2x32xf32>
    %200 = arith.divf %198, %199 : vector<2x32xf32>
    %201 = vector.extract_strided_slice %188 {offsets = [0, 64], sizes = [2, 32], strides = [1, 1]} : vector<2x128xf32> to vector<2x32xf32>
    %202 = math.tanh %201 : vector<2x32xf32>
    %203 = vector.extract_strided_slice %188 {offsets = [0, 96], sizes = [2, 32], strides = [1, 1]} : vector<2x128xf32> to vector<2x32xf32>
    %204 = arith.negf %203 : vector<2x32xf32>
    %205 = math.exp %204 : vector<2x32xf32>
    %cst_60 = arith.constant 1.000000e+00 : f32
    %206 = vector.broadcast %cst_60 : f32 to vector<2x32xf32>
    %207 = arith.addf %206, %205 : vector<2x32xf32>
    %208 = arith.divf %206, %207 : vector<2x32xf32>
    %209 = arith.mulf %200, %182 : vector<2x32xf32>
    %210 = arith.mulf %194, %202 : vector<2x32xf32>
    %211 = arith.addf %209, %210 : vector<2x32xf32>
    %212 = math.tanh %211 : vector<2x32xf32>
    %213 = arith.mulf %208, %212 : vector<2x32xf32>
    %c12 = arith.constant 12 : index
    %c0_61 = arith.constant 0 : index
    %214 = vector.load %arg17[%c12, %c0_61] : memref<16x32xf32, #tpu.memory_space<vmem>>, vector<2x32xf32>
    tpu.vector_store %arg17[%c12, %c0_61], %213 {strides = array<i32>} : memref<16x32xf32, #tpu.memory_space<vmem>>, vector<2x32xf32>,
    %c7 = arith.constant 7 : index
    %c0_62 = arith.constant 0 : index
    %215 = tpu.strided_load %arg16[%c7, %c0_62] {strides = array<i32: 8, 1>} : memref<16x128xf32, #tpu.memory_space<vmem>>, vector<2x128xf32>
    %cst_63 = arith.constant dense<0.000000e+00> : vector<2x128xf32>
    %216 = tpu.matmul %213, %7, %cst_63 {dimension_numbers = #tpu.dot_dimension_numbers<[1], [0], [0], [1], [0, 0, 1, 1], [], []>} : vector<2x32xf32>, vector<32x128xf32>, vector<2x128xf32> -> vector<2x128xf32>
    %217 = arith.addf %215, %216 : vector<2x128xf32>
    %218 = vector.extract_strided_slice %217 {offsets = [0, 0], sizes = [2, 32], strides = [1, 1]} : vector<2x128xf32> to vector<2x32xf32>
    %219 = arith.negf %218 : vector<2x32xf32>
    %220 = math.exp %219 : vector<2x32xf32>
    %cst_64 = arith.constant 1.000000e+00 : f32
    %221 = vector.broadcast %cst_64 : f32 to vector<2x32xf32>
    %222 = arith.addf %221, %220 : vector<2x32xf32>
    %223 = arith.divf %221, %222 : vector<2x32xf32>
    %224 = vector.extract_strided_slice %217 {offsets = [0, 32], sizes = [2, 32], strides = [1, 1]} : vector<2x128xf32> to vector<2x32xf32>
    %225 = arith.negf %224 : vector<2x32xf32>
    %226 = math.exp %225 : vector<2x32xf32>
    %cst_65 = arith.constant 1.000000e+00 : f32
    %227 = vector.broadcast %cst_65 : f32 to vector<2x32xf32>
    %228 = arith.addf %227, %226 : vector<2x32xf32>
    %229 = arith.divf %227, %228 : vector<2x32xf32>
    %230 = vector.extract_strided_slice %217 {offsets = [0, 64], sizes = [2, 32], strides = [1, 1]} : vector<2x128xf32> to vector<2x32xf32>
    %231 = math.tanh %230 : vector<2x32xf32>
    %232 = vector.extract_strided_slice %217 {offsets = [0, 96], sizes = [2, 32], strides = [1, 1]} : vector<2x128xf32> to vector<2x32xf32>
    %233 = arith.negf %232 : vector<2x32xf32>
    %234 = math.exp %233 : vector<2x32xf32>
    %cst_66 = arith.constant 1.000000e+00 : f32
    %235 = vector.broadcast %cst_66 : f32 to vector<2x32xf32>
    %236 = arith.addf %235, %234 : vector<2x32xf32>
    %237 = arith.divf %235, %236 : vector<2x32xf32>
    %238 = arith.mulf %229, %211 : vector<2x32xf32>
    %239 = arith.mulf %223, %231 : vector<2x32xf32>
    %240 = arith.addf %238, %239 : vector<2x32xf32>
    %241 = math.tanh %240 : vector<2x32xf32>
    %242 = arith.mulf %237, %241 : vector<2x32xf32>
    %c14 = arith.constant 14 : index
    %c0_67 = arith.constant 0 : index
    %243 = vector.load %arg17[%c14, %c0_67] : memref<16x32xf32, #tpu.memory_space<vmem>>, vector<2x32xf32>
    tpu.vector_store %arg17[%c14, %c0_67], %242 {strides = array<i32>} : memref<16x32xf32, #tpu.memory_space<vmem>>, vector<2x32xf32>,
    %c0_68 = arith.constant 0 : index
    %c0_69 = arith.constant 0 : index
    %244 = vector.load %arg17[%c0_68, %c0_69] : memref<16x32xf32, #tpu.memory_space<vmem>>, vector<16x32xf32>
    %c0_70 = arith.constant 0 : index
    %c0_71 = arith.constant 0 : index
    %245 = vector.load %arg4[%c0_70, %c0_71] : memref<32x128xf32, #tpu.memory_space<vmem>>, vector<32x128xf32>
    %cst_72 = arith.constant dense<0.000000e+00> : vector<16x128xf32>
    %246 = tpu.matmul %244, %245, %cst_72 {dimension_numbers = #tpu.dot_dimension_numbers<[1], [0], [0], [1], [0, 0, 1, 1], [], []>} : vector<16x32xf32>, vector<32x128xf32>, vector<16x128xf32> -> vector<16x128xf32>
    %c0_73 = arith.constant 0 : index
    %c0_74 = arith.constant 0 : index
    %247 = vector.load %arg6[%c0_73, %c0_74] : memref<1x128xf32, #tpu.memory_space<vmem>>, vector<1x128xf32>
    %248 = vector.broadcast %247 : vector<1x128xf32> to vector<16x128xf32>
    %249 = arith.addf %246, %248 : vector<16x128xf32>
    %c0_75 = arith.constant 0 : index
    %c0_76 = arith.constant 0 : index
    %250 = vector.load %arg16[%c0_75, %c0_76] : memref<16x128xf32, #tpu.memory_space<vmem>>, vector<16x128xf32>
    tpu.vector_store %arg16[%c0_75, %c0_76], %249 {strides = array<i32>} : memref<16x128xf32, #tpu.memory_space<vmem>>, vector<16x128xf32>,
    %c0_77 = arith.constant 0 : index
    %c0_78 = arith.constant 0 : index
    %251 = vector.load %arg5[%c0_77, %c0_78] : memref<32x128xf32, #tpu.memory_space<vmem>>, vector<32x128xf32>
    %c1_79 = arith.constant 1 : index
    %c0_80 = arith.constant 0 : index
    %c0_81 = arith.constant 0 : index
    %252 = vector.load %arg7[%c1_79, %c0_80, %c0_81] : memref<2x2x32xf32, #tpu.memory_space<vmem>>, vector<1x2x32xf32>
    %253 = vector.shape_cast %252 : vector<1x2x32xf32> to vector<2x32xf32>
    %c1_82 = arith.constant 1 : index
    %c0_83 = arith.constant 0 : index
    %c0_84 = arith.constant 0 : index
    %254 = vector.load %arg8[%c1_82, %c0_83, %c0_84] : memref<2x2x32xf32, #tpu.memory_space<vmem>>, vector<1x2x32xf32>
    %255 = vector.shape_cast %254 : vector<1x2x32xf32> to vector<2x32xf32>
    %c0_85 = arith.constant 0 : index
    %c0_86 = arith.constant 0 : index
    %256 = vector.load %arg16[%c0_85, %c0_86] : memref<16x128xf32, #tpu.memory_space<vmem>>, vector<2x128xf32>
    %cst_87 = arith.constant dense<0.000000e+00> : vector<2x128xf32>
    %257 = tpu.matmul %253, %251, %cst_87 {dimension_numbers = #tpu.dot_dimension_numbers<[1], [0], [0], [1], [0, 0, 1, 1], [], []>} : vector<2x32xf32>, vector<32x128xf32>, vector<2x128xf32> -> vector<2x128xf32>
    %258 = arith.addf %256, %257 : vector<2x128xf32>
    %259 = vector.extract_strided_slice %258 {offsets = [0, 0], sizes = [2, 32], strides = [1, 1]} : vector<2x128xf32> to vector<2x32xf32>
    %260 = arith.negf %259 : vector<2x32xf32>
    %261 = math.exp %260 : vector<2x32xf32>
    %cst_88 = arith.constant 1.000000e+00 : f32
    %262 = vector.broadcast %cst_88 : f32 to vector<2x32xf32>
    %263 = arith.addf %262, %261 : vector<2x32xf32>
    %264 = arith.divf %262, %263 : vector<2x32xf32>
    %265 = vector.extract_strided_slice %258 {offsets = [0, 32], sizes = [2, 32], strides = [1, 1]} : vector<2x128xf32> to vector<2x32xf32>
    %266 = arith.negf %265 : vector<2x32xf32>
    %267 = math.exp %266 : vector<2x32xf32>
    %cst_89 = arith.constant 1.000000e+00 : f32
    %268 = vector.broadcast %cst_89 : f32 to vector<2x32xf32>
    %269 = arith.addf %268, %267 : vector<2x32xf32>
    %270 = arith.divf %268, %269 : vector<2x32xf32>
    %271 = vector.extract_strided_slice %258 {offsets = [0, 64], sizes = [2, 32], strides = [1, 1]} : vector<2x128xf32> to vector<2x32xf32>
    %272 = math.tanh %271 : vector<2x32xf32>
    %273 = vector.extract_strided_slice %258 {offsets = [0, 96], sizes = [2, 32], strides = [1, 1]} : vector<2x128xf32> to vector<2x32xf32>
    %274 = arith.negf %273 : vector<2x32xf32>
    %275 = math.exp %274 : vector<2x32xf32>
    %cst_90 = arith.constant 1.000000e+00 : f32
    %276 = vector.broadcast %cst_90 : f32 to vector<2x32xf32>
    %277 = arith.addf %276, %275 : vector<2x32xf32>
    %278 = arith.divf %276, %277 : vector<2x32xf32>
    %279 = arith.mulf %270, %255 : vector<2x32xf32>
    %280 = arith.mulf %264, %272 : vector<2x32xf32>
    %281 = arith.addf %279, %280 : vector<2x32xf32>
    %282 = math.tanh %281 : vector<2x32xf32>
    %283 = arith.mulf %278, %282 : vector<2x32xf32>
    %c2_91 = arith.constant 2 : index
    %c0_92 = arith.constant 0 : index
    %284 = vector.load %arg16[%c2_91, %c0_92] : memref<16x128xf32, #tpu.memory_space<vmem>>, vector<2x128xf32>
    %cst_93 = arith.constant dense<0.000000e+00> : vector<2x128xf32>
    %285 = tpu.matmul %283, %251, %cst_93 {dimension_numbers = #tpu.dot_dimension_numbers<[1], [0], [0], [1], [0, 0, 1, 1], [], []>} : vector<2x32xf32>, vector<32x128xf32>, vector<2x128xf32> -> vector<2x128xf32>
    %286 = arith.addf %284, %285 : vector<2x128xf32>
    %287 = vector.extract_strided_slice %286 {offsets = [0, 0], sizes = [2, 32], strides = [1, 1]} : vector<2x128xf32> to vector<2x32xf32>
    %288 = arith.negf %287 : vector<2x32xf32>
    %289 = math.exp %288 : vector<2x32xf32>
    %cst_94 = arith.constant 1.000000e+00 : f32
    %290 = vector.broadcast %cst_94 : f32 to vector<2x32xf32>
    %291 = arith.addf %290, %289 : vector<2x32xf32>
    %292 = arith.divf %290, %291 : vector<2x32xf32>
    %293 = vector.extract_strided_slice %286 {offsets = [0, 32], sizes = [2, 32], strides = [1, 1]} : vector<2x128xf32> to vector<2x32xf32>
    %294 = arith.negf %293 : vector<2x32xf32>
    %295 = math.exp %294 : vector<2x32xf32>
    %cst_95 = arith.constant 1.000000e+00 : f32
    %296 = vector.broadcast %cst_95 : f32 to vector<2x32xf32>
    %297 = arith.addf %296, %295 : vector<2x32xf32>
    %298 = arith.divf %296, %297 : vector<2x32xf32>
    %299 = vector.extract_strided_slice %286 {offsets = [0, 64], sizes = [2, 32], strides = [1, 1]} : vector<2x128xf32> to vector<2x32xf32>
    %300 = math.tanh %299 : vector<2x32xf32>
    %301 = vector.extract_strided_slice %286 {offsets = [0, 96], sizes = [2, 32], strides = [1, 1]} : vector<2x128xf32> to vector<2x32xf32>
    %302 = arith.negf %301 : vector<2x32xf32>
    %303 = math.exp %302 : vector<2x32xf32>
    %cst_96 = arith.constant 1.000000e+00 : f32
    %304 = vector.broadcast %cst_96 : f32 to vector<2x32xf32>
    %305 = arith.addf %304, %303 : vector<2x32xf32>
    %306 = arith.divf %304, %305 : vector<2x32xf32>
    %307 = arith.mulf %298, %281 : vector<2x32xf32>
    %308 = arith.mulf %292, %300 : vector<2x32xf32>
    %309 = arith.addf %307, %308 : vector<2x32xf32>
    %310 = math.tanh %309 : vector<2x32xf32>
    %311 = arith.mulf %306, %310 : vector<2x32xf32>
    %c4_97 = arith.constant 4 : index
    %c0_98 = arith.constant 0 : index
    %312 = vector.load %arg16[%c4_97, %c0_98] : memref<16x128xf32, #tpu.memory_space<vmem>>, vector<2x128xf32>
    %cst_99 = arith.constant dense<0.000000e+00> : vector<2x128xf32>
    %313 = tpu.matmul %311, %251, %cst_99 {dimension_numbers = #tpu.dot_dimension_numbers<[1], [0], [0], [1], [0, 0, 1, 1], [], []>} : vector<2x32xf32>, vector<32x128xf32>, vector<2x128xf32> -> vector<2x128xf32>
    %314 = arith.addf %312, %313 : vector<2x128xf32>
    %315 = vector.extract_strided_slice %314 {offsets = [0, 0], sizes = [2, 32], strides = [1, 1]} : vector<2x128xf32> to vector<2x32xf32>
    %316 = arith.negf %315 : vector<2x32xf32>
    %317 = math.exp %316 : vector<2x32xf32>
    %cst_100 = arith.constant 1.000000e+00 : f32
    %318 = vector.broadcast %cst_100 : f32 to vector<2x32xf32>
    %319 = arith.addf %318, %317 : vector<2x32xf32>
    %320 = arith.divf %318, %319 : vector<2x32xf32>
    %321 = vector.extract_strided_slice %314 {offsets = [0, 32], sizes = [2, 32], strides = [1, 1]} : vector<2x128xf32> to vector<2x32xf32>
    %322 = arith.negf %321 : vector<2x32xf32>
    %323 = math.exp %322 : vector<2x32xf32>
    %cst_101 = arith.constant 1.000000e+00 : f32
    %324 = vector.broadcast %cst_101 : f32 to vector<2x32xf32>
    %325 = arith.addf %324, %323 : vector<2x32xf32>
    %326 = arith.divf %324, %325 : vector<2x32xf32>
    %327 = vector.extract_strided_slice %314 {offsets = [0, 64], sizes = [2, 32], strides = [1, 1]} : vector<2x128xf32> to vector<2x32xf32>
    %328 = math.tanh %327 : vector<2x32xf32>
    %329 = vector.extract_strided_slice %314 {offsets = [0, 96], sizes = [2, 32], strides = [1, 1]} : vector<2x128xf32> to vector<2x32xf32>
    %330 = arith.negf %329 : vector<2x32xf32>
    %331 = math.exp %330 : vector<2x32xf32>
    %cst_102 = arith.constant 1.000000e+00 : f32
    %332 = vector.broadcast %cst_102 : f32 to vector<2x32xf32>
    %333 = arith.addf %332, %331 : vector<2x32xf32>
    %334 = arith.divf %332, %333 : vector<2x32xf32>
    %335 = arith.mulf %326, %309 : vector<2x32xf32>
    %336 = arith.mulf %320, %328 : vector<2x32xf32>
    %337 = arith.addf %335, %336 : vector<2x32xf32>
    %338 = math.tanh %337 : vector<2x32xf32>
    %339 = arith.mulf %334, %338 : vector<2x32xf32>
    %c6_103 = arith.constant 6 : index
    %c0_104 = arith.constant 0 : index
    %340 = vector.load %arg16[%c6_103, %c0_104] : memref<16x128xf32, #tpu.memory_space<vmem>>, vector<2x128xf32>
    %cst_105 = arith.constant dense<0.000000e+00> : vector<2x128xf32>
    %341 = tpu.matmul %339, %251, %cst_105 {dimension_numbers = #tpu.dot_dimension_numbers<[1], [0], [0], [1], [0, 0, 1, 1], [], []>} : vector<2x32xf32>, vector<32x128xf32>, vector<2x128xf32> -> vector<2x128xf32>
    %342 = arith.addf %340, %341 : vector<2x128xf32>
    %343 = vector.extract_strided_slice %342 {offsets = [0, 0], sizes = [2, 32], strides = [1, 1]} : vector<2x128xf32> to vector<2x32xf32>
    %344 = arith.negf %343 : vector<2x32xf32>
    %345 = math.exp %344 : vector<2x32xf32>
    %cst_106 = arith.constant 1.000000e+00 : f32
    %346 = vector.broadcast %cst_106 : f32 to vector<2x32xf32>
    %347 = arith.addf %346, %345 : vector<2x32xf32>
    %348 = arith.divf %346, %347 : vector<2x32xf32>
    %349 = vector.extract_strided_slice %342 {offsets = [0, 32], sizes = [2, 32], strides = [1, 1]} : vector<2x128xf32> to vector<2x32xf32>
    %350 = arith.negf %349 : vector<2x32xf32>
    %351 = math.exp %350 : vector<2x32xf32>
    %cst_107 = arith.constant 1.000000e+00 : f32
    %352 = vector.broadcast %cst_107 : f32 to vector<2x32xf32>
    %353 = arith.addf %352, %351 : vector<2x32xf32>
    %354 = arith.divf %352, %353 : vector<2x32xf32>
    %355 = vector.extract_strided_slice %342 {offsets = [0, 64], sizes = [2, 32], strides = [1, 1]} : vector<2x128xf32> to vector<2x32xf32>
    %356 = math.tanh %355 : vector<2x32xf32>
    %357 = vector.extract_strided_slice %342 {offsets = [0, 96], sizes = [2, 32], strides = [1, 1]} : vector<2x128xf32> to vector<2x32xf32>
    %358 = arith.negf %357 : vector<2x32xf32>
    %359 = math.exp %358 : vector<2x32xf32>
    %cst_108 = arith.constant 1.000000e+00 : f32
    %360 = vector.broadcast %cst_108 : f32 to vector<2x32xf32>
    %361 = arith.addf %360, %359 : vector<2x32xf32>
    %362 = arith.divf %360, %361 : vector<2x32xf32>
    %363 = arith.mulf %354, %337 : vector<2x32xf32>
    %364 = arith.mulf %348, %356 : vector<2x32xf32>
    %365 = arith.addf %363, %364 : vector<2x32xf32>
    %366 = math.tanh %365 : vector<2x32xf32>
    %367 = arith.mulf %362, %366 : vector<2x32xf32>
    %c8_109 = arith.constant 8 : index
    %c0_110 = arith.constant 0 : index
    %368 = vector.load %arg16[%c8_109, %c0_110] : memref<16x128xf32, #tpu.memory_space<vmem>>, vector<2x128xf32>
    %cst_111 = arith.constant dense<0.000000e+00> : vector<2x128xf32>
    %369 = tpu.matmul %367, %251, %cst_111 {dimension_numbers = #tpu.dot_dimension_numbers<[1], [0], [0], [1], [0, 0, 1, 1], [], []>} : vector<2x32xf32>, vector<32x128xf32>, vector<2x128xf32> -> vector<2x128xf32>
    %370 = arith.addf %368, %369 : vector<2x128xf32>
    %371 = vector.extract_strided_slice %370 {offsets = [0, 0], sizes = [2, 32], strides = [1, 1]} : vector<2x128xf32> to vector<2x32xf32>
    %372 = arith.negf %371 : vector<2x32xf32>
    %373 = math.exp %372 : vector<2x32xf32>
    %cst_112 = arith.constant 1.000000e+00 : f32
    %374 = vector.broadcast %cst_112 : f32 to vector<2x32xf32>
    %375 = arith.addf %374, %373 : vector<2x32xf32>
    %376 = arith.divf %374, %375 : vector<2x32xf32>
    %377 = vector.extract_strided_slice %370 {offsets = [0, 32], sizes = [2, 32], strides = [1, 1]} : vector<2x128xf32> to vector<2x32xf32>
    %378 = arith.negf %377 : vector<2x32xf32>
    %379 = math.exp %378 : vector<2x32xf32>
    %cst_113 = arith.constant 1.000000e+00 : f32
    %380 = vector.broadcast %cst_113 : f32 to vector<2x32xf32>
    %381 = arith.addf %380, %379 : vector<2x32xf32>
    %382 = arith.divf %380, %381 : vector<2x32xf32>
    %383 = vector.extract_strided_slice %370 {offsets = [0, 64], sizes = [2, 32], strides = [1, 1]} : vector<2x128xf32> to vector<2x32xf32>
    %384 = math.tanh %383 : vector<2x32xf32>
    %385 = vector.extract_strided_slice %370 {offsets = [0, 96], sizes = [2, 32], strides = [1, 1]} : vector<2x128xf32> to vector<2x32xf32>
    %386 = arith.negf %385 : vector<2x32xf32>
    %387 = math.exp %386 : vector<2x32xf32>
    %cst_114 = arith.constant 1.000000e+00 : f32
    %388 = vector.broadcast %cst_114 : f32 to vector<2x32xf32>
    %389 = arith.addf %388, %387 : vector<2x32xf32>
    %390 = arith.divf %388, %389 : vector<2x32xf32>
    %391 = arith.mulf %382, %365 : vector<2x32xf32>
    %392 = arith.mulf %376, %384 : vector<2x32xf32>
    %393 = arith.addf %391, %392 : vector<2x32xf32>
    %394 = math.tanh %393 : vector<2x32xf32>
    %395 = arith.mulf %390, %394 : vector<2x32xf32>
    %c10_115 = arith.constant 10 : index
    %c0_116 = arith.constant 0 : index
    %396 = vector.load %arg16[%c10_115, %c0_116] : memref<16x128xf32, #tpu.memory_space<vmem>>, vector<2x128xf32>
    %cst_117 = arith.constant dense<0.000000e+00> : vector<2x128xf32>
    %397 = tpu.matmul %395, %251, %cst_117 {dimension_numbers = #tpu.dot_dimension_numbers<[1], [0], [0], [1], [0, 0, 1, 1], [], []>} : vector<2x32xf32>, vector<32x128xf32>, vector<2x128xf32> -> vector<2x128xf32>
    %398 = arith.addf %396, %397 : vector<2x128xf32>
    %399 = vector.extract_strided_slice %398 {offsets = [0, 0], sizes = [2, 32], strides = [1, 1]} : vector<2x128xf32> to vector<2x32xf32>
    %400 = arith.negf %399 : vector<2x32xf32>
    %401 = math.exp %400 : vector<2x32xf32>
    %cst_118 = arith.constant 1.000000e+00 : f32
    %402 = vector.broadcast %cst_118 : f32 to vector<2x32xf32>
    %403 = arith.addf %402, %401 : vector<2x32xf32>
    %404 = arith.divf %402, %403 : vector<2x32xf32>
    %405 = vector.extract_strided_slice %398 {offsets = [0, 32], sizes = [2, 32], strides = [1, 1]} : vector<2x128xf32> to vector<2x32xf32>
    %406 = arith.negf %405 : vector<2x32xf32>
    %407 = math.exp %406 : vector<2x32xf32>
    %cst_119 = arith.constant 1.000000e+00 : f32
    %408 = vector.broadcast %cst_119 : f32 to vector<2x32xf32>
    %409 = arith.addf %408, %407 : vector<2x32xf32>
    %410 = arith.divf %408, %409 : vector<2x32xf32>
    %411 = vector.extract_strided_slice %398 {offsets = [0, 64], sizes = [2, 32], strides = [1, 1]} : vector<2x128xf32> to vector<2x32xf32>
    %412 = math.tanh %411 : vector<2x32xf32>
    %413 = vector.extract_strided_slice %398 {offsets = [0, 96], sizes = [2, 32], strides = [1, 1]} : vector<2x128xf32> to vector<2x32xf32>
    %414 = arith.negf %413 : vector<2x32xf32>
    %415 = math.exp %414 : vector<2x32xf32>
    %cst_120 = arith.constant 1.000000e+00 : f32
    %416 = vector.broadcast %cst_120 : f32 to vector<2x32xf32>
    %417 = arith.addf %416, %415 : vector<2x32xf32>
    %418 = arith.divf %416, %417 : vector<2x32xf32>
    %419 = arith.mulf %410, %393 : vector<2x32xf32>
    %420 = arith.mulf %404, %412 : vector<2x32xf32>
    %421 = arith.addf %419, %420 : vector<2x32xf32>
    %422 = math.tanh %421 : vector<2x32xf32>
    %423 = arith.mulf %418, %422 : vector<2x32xf32>
    %c12_121 = arith.constant 12 : index
    %c0_122 = arith.constant 0 : index
    %424 = vector.load %arg16[%c12_121, %c0_122] : memref<16x128xf32, #tpu.memory_space<vmem>>, vector<2x128xf32>
    %cst_123 = arith.constant dense<0.000000e+00> : vector<2x128xf32>
    %425 = tpu.matmul %423, %251, %cst_123 {dimension_numbers = #tpu.dot_dimension_numbers<[1], [0], [0], [1], [0, 0, 1, 1], [], []>} : vector<2x32xf32>, vector<32x128xf32>, vector<2x128xf32> -> vector<2x128xf32>
    %426 = arith.addf %424, %425 : vector<2x128xf32>
    %427 = vector.extract_strided_slice %426 {offsets = [0, 0], sizes = [2, 32], strides = [1, 1]} : vector<2x128xf32> to vector<2x32xf32>
    %428 = arith.negf %427 : vector<2x32xf32>
    %429 = math.exp %428 : vector<2x32xf32>
    %cst_124 = arith.constant 1.000000e+00 : f32
    %430 = vector.broadcast %cst_124 : f32 to vector<2x32xf32>
    %431 = arith.addf %430, %429 : vector<2x32xf32>
    %432 = arith.divf %430, %431 : vector<2x32xf32>
    %433 = vector.extract_strided_slice %426 {offsets = [0, 32], sizes = [2, 32], strides = [1, 1]} : vector<2x128xf32> to vector<2x32xf32>
    %434 = arith.negf %433 : vector<2x32xf32>
    %435 = math.exp %434 : vector<2x32xf32>
    %cst_125 = arith.constant 1.000000e+00 : f32
    %436 = vector.broadcast %cst_125 : f32 to vector<2x32xf32>
    %437 = arith.addf %436, %435 : vector<2x32xf32>
    %438 = arith.divf %436, %437 : vector<2x32xf32>
    %439 = vector.extract_strided_slice %426 {offsets = [0, 64], sizes = [2, 32], strides = [1, 1]} : vector<2x128xf32> to vector<2x32xf32>
    %440 = math.tanh %439 : vector<2x32xf32>
    %441 = vector.extract_strided_slice %426 {offsets = [0, 96], sizes = [2, 32], strides = [1, 1]} : vector<2x128xf32> to vector<2x32xf32>
    %442 = arith.negf %441 : vector<2x32xf32>
    %443 = math.exp %442 : vector<2x32xf32>
    %cst_126 = arith.constant 1.000000e+00 : f32
    %444 = vector.broadcast %cst_126 : f32 to vector<2x32xf32>
    %445 = arith.addf %444, %443 : vector<2x32xf32>
    %446 = arith.divf %444, %445 : vector<2x32xf32>
    %447 = arith.mulf %438, %421 : vector<2x32xf32>
    %448 = arith.mulf %432, %440 : vector<2x32xf32>
    %449 = arith.addf %447, %448 : vector<2x32xf32>
    %450 = math.tanh %449 : vector<2x32xf32>
    %451 = arith.mulf %446, %450 : vector<2x32xf32>
    %c14_127 = arith.constant 14 : index
    %c0_128 = arith.constant 0 : index
    %452 = vector.load %arg16[%c14_127, %c0_128] : memref<16x128xf32, #tpu.memory_space<vmem>>, vector<2x128xf32>
    %cst_129 = arith.constant dense<0.000000e+00> : vector<2x128xf32>
    %453 = tpu.matmul %451, %251, %cst_129 {dimension_numbers = #tpu.dot_dimension_numbers<[1], [0], [0], [1], [0, 0, 1, 1], [], []>} : vector<2x32xf32>, vector<32x128xf32>, vector<2x128xf32> -> vector<2x128xf32>
    %454 = arith.addf %452, %453 : vector<2x128xf32>
    %455 = vector.extract_strided_slice %454 {offsets = [0, 0], sizes = [2, 32], strides = [1, 1]} : vector<2x128xf32> to vector<2x32xf32>
    %456 = arith.negf %455 : vector<2x32xf32>
    %457 = math.exp %456 : vector<2x32xf32>
    %cst_130 = arith.constant 1.000000e+00 : f32
    %458 = vector.broadcast %cst_130 : f32 to vector<2x32xf32>
    %459 = arith.addf %458, %457 : vector<2x32xf32>
    %460 = arith.divf %458, %459 : vector<2x32xf32>
    %461 = vector.extract_strided_slice %454 {offsets = [0, 32], sizes = [2, 32], strides = [1, 1]} : vector<2x128xf32> to vector<2x32xf32>
    %462 = arith.negf %461 : vector<2x32xf32>
    %463 = math.exp %462 : vector<2x32xf32>
    %cst_131 = arith.constant 1.000000e+00 : f32
    %464 = vector.broadcast %cst_131 : f32 to vector<2x32xf32>
    %465 = arith.addf %464, %463 : vector<2x32xf32>
    %466 = arith.divf %464, %465 : vector<2x32xf32>
    %467 = vector.extract_strided_slice %454 {offsets = [0, 64], sizes = [2, 32], strides = [1, 1]} : vector<2x128xf32> to vector<2x32xf32>
    %468 = math.tanh %467 : vector<2x32xf32>
    %469 = vector.extract_strided_slice %454 {offsets = [0, 96], sizes = [2, 32], strides = [1, 1]} : vector<2x128xf32> to vector<2x32xf32>
    %470 = arith.negf %469 : vector<2x32xf32>
    %471 = math.exp %470 : vector<2x32xf32>
    %cst_132 = arith.constant 1.000000e+00 : f32
    %472 = vector.broadcast %cst_132 : f32 to vector<2x32xf32>
    %473 = arith.addf %472, %471 : vector<2x32xf32>
    %474 = arith.divf %472, %473 : vector<2x32xf32>
    %475 = arith.mulf %466, %449 : vector<2x32xf32>
    %476 = arith.mulf %460, %468 : vector<2x32xf32>
    %477 = arith.addf %475, %476 : vector<2x32xf32>
    %478 = math.tanh %477 : vector<2x32xf32>
    %479 = arith.mulf %474, %478 : vector<2x32xf32>
    %c0_133 = arith.constant 0 : index
    %c0_134 = arith.constant 0 : index
    %480 = vector.load %arg9[%c0_133, %c0_134] : memref<32x16xf32, #tpu.memory_space<vmem>>, vector<32x16xf32>
    %cst_135 = arith.constant dense<0.000000e+00> : vector<2x16xf32>
    %481 = tpu.matmul %479, %480, %cst_135 {dimension_numbers = #tpu.dot_dimension_numbers<[1], [0], [0], [1], [0, 0, 1, 1], [], []>} : vector<2x32xf32>, vector<32x16xf32>, vector<2x16xf32> -> vector<2x16xf32>
    %c0_136 = arith.constant 0 : index
    %c0_137 = arith.constant 0 : index
    %482 = vector.load %arg10[%c0_136, %c0_137] : memref<1x16xf32, #tpu.memory_space<vmem>>, vector<1x16xf32>
    %483 = vector.broadcast %482 : vector<1x16xf32> to vector<2x16xf32>
    %484 = arith.addf %481, %483 : vector<2x16xf32>
    %cst_138 = arith.constant 0.000000e+00 : f32
    %485 = vector.broadcast %cst_138 : f32 to vector<2x16xf32>
    %486 = arith.maximumf %484, %485 : vector<2x16xf32>
    %c0_139 = arith.constant 0 : index
    %c0_140 = arith.constant 0 : index
    %487 = vector.load %arg11[%c0_139, %c0_140] : memref<16x16xf32, #tpu.memory_space<vmem>>, vector<16x16xf32>
    %cst_141 = arith.constant dense<0.000000e+00> : vector<2x16xf32>
    %488 = tpu.matmul %486, %487, %cst_141 {dimension_numbers = #tpu.dot_dimension_numbers<[1], [0], [0], [1], [0, 0, 1, 1], [], []>} : vector<2x16xf32>, vector<16x16xf32>, vector<2x16xf32> -> vector<2x16xf32>
    %c0_142 = arith.constant 0 : index
    %c0_143 = arith.constant 0 : index
    %489 = vector.load %arg12[%c0_142, %c0_143] : memref<1x16xf32, #tpu.memory_space<vmem>>, vector<1x16xf32>
    %490 = vector.broadcast %489 : vector<1x16xf32> to vector<2x16xf32>
    %491 = arith.addf %488, %490 : vector<2x16xf32>
    %cst_144 = arith.constant 0.000000e+00 : f32
    %492 = vector.broadcast %cst_144 : f32 to vector<2x16xf32>
    %493 = arith.maximumf %491, %492 : vector<2x16xf32>
    %c0_145 = arith.constant 0 : index
    %c0_146 = arith.constant 0 : index
    %494 = vector.load %arg13[%c0_145, %c0_146] : memref<16x5xf32, #tpu.memory_space<vmem>>, vector<16x5xf32>
    %cst_147 = arith.constant dense<0.000000e+00> : vector<2x5xf32>
    %495 = tpu.matmul %493, %494, %cst_147 {dimension_numbers = #tpu.dot_dimension_numbers<[1], [0], [0], [1], [0, 0, 1, 1], [], []>} : vector<2x16xf32>, vector<16x5xf32>, vector<2x5xf32> -> vector<2x5xf32>
    %c0_148 = arith.constant 0 : index
    %c0_149 = arith.constant 0 : index
    %496 = vector.load %arg14[%c0_148, %c0_149] : memref<1x5xf32, #tpu.memory_space<vmem>>, vector<1x5xf32>
    %497 = vector.broadcast %496 : vector<1x5xf32> to vector<2x5xf32>
    %498 = arith.addf %495, %497 : vector<2x5xf32>
    %c0_150 = arith.constant 0 : index
    %c0_151 = arith.constant 0 : index
    %499 = vector.load %arg15[%c0_150, %c0_151] : memref<2x5xf32, #tpu.memory_space<vmem>>, vector<2x5xf32>
    tpu.vector_store %arg15[%c0_150, %c0_151], %498 {strides = array<i32>} : memref<2x5xf32, #tpu.memory_space<vmem>>, vector<2x5xf32>,
    return
  }
}

</mosaic_0001>

<bundles_post_ra>
// kernel: forward.1
= control target key start
LH: loop header
LB: loop body
LE: loop exit
PB: predicated region body
PF: predicated region fallthrough
CT: control target
= control target key end

     0   :  { %20 = vsyncpa [#allocation5], 0  ;;  %s3506_s0 = inlined_call_operand.hbm [shape: f32[16,16], index: 0, kind: input, shape index: {}]   ;;  %s3507_s1 = inlined_call_operand.vmem [shape: f32[16,128], index: 1, kind: input, shape index: {}]   ;;  %s3508_s2 = inlined_call_operand.vmem [shape: f32[32,128], index: 2, kind: input, shape index: {}]   ;;  %s3509_s3 = inlined_call_operand.vmem [shape: f32[1,128], index: 3, kind: input, shape index: {}]   ;;  %s3510_s4 = inlined_call_operand.vmem [shape: f32[32,128], index: 4, kind: input, shape index: {}]   ;;  %s3511_s5 = inlined_call_operand.vmem [shape: f32[32,128], index: 5, kind: input, shape index: {}]   ;;  %s3512_s6 = inlined_call_operand.hbm [shape: f32[1,128], index: 6, kind: input, shape index: {}]   ;;  %s3513_s7 = inlined_call_operand.vmem [shape: f32[2,2,32], index: 7, kind: input, shape index: {}]   ;;  %s3514_s8 = inlined_call_operand.vmem [shape: f32[2,2,32], index: 8, kind: input, shape index: {}]   ;;  %s3515_s9 = inlined_call_operand.vmem [shape: f32[32,16], index: 9, kind: input, shape index: {}]   ;;  %s3516_s10 = inlined_call_operand.hbm [shape: f32[1,16], index: 10, kind: input, shape index: {}]   ;;  %s3517_s11 = inlined_call_operand.hbm [shape: f32[16,16], index: 11, kind: input, shape index: {}]   ;;  %s3518_s12 = inlined_call_operand.hbm [shape: f32[1,16], index: 12, kind: input, shape index: {}]   ;;  %s3519_s13 = inlined_call_operand.vmem [shape: f32[16,5], index: 13, kind: input, shape index: {}]   ;;  %s3520_s14 = inlined_call_operand.hbm [shape: f32[1,5], index: 14, kind: input, shape index: {}]   ;;  %s3521_s15 = inlined_call_operand.hbm [shape: f32[2,5], index: 15, kind: output, shape index: {}]  }
   0x1   :  { %21 = vsyncpa [#allocation8], 0 }
   0x2   :  { %22 = vsyncpa [#allocation11], 0 }
   0x3   :  { %23 = vsyncpa [#allocation14], 0 }
   0x4   :  { %24 = vsyncpa [#allocation6], 0  ;;  %s3042_s18 = smov [#allocation7]   ;;  %s2878_s22 = scalar_lea.hbm %s3512_s6, 16 }
   0x5   :  { %s53_s19 = sshll.u32 %s3042_s18, 4  ;;  %p2879_p0 = scmp.ne.s32.totalorder %s3512_s6, %s2878_s22  ;;  %s54_s19 = int_to_ptr.vmem [resolvable:$true] %s53_s19 }
   0x6   :  { %p2882_p1 = scmp.lt.u32.totalorder %s2878_s22, %s3512_s6 }
   0x8   :  { %p2884_p2 = pnand %p2882_p1, %p2879_p0 }
   0xa   :  { %2887 = shalt.err (!%p2884_p2)
}
   0xb   :  { %s2888_s27 = scalar_lea.vmem %s54_s19, 16  ;;  %s2892_s28 = scalar_lea.vmem %s54_s19, 32 }
   0xc   :  { %p2889_p3 = scmp.ne.s32.totalorder %s54_s19, %s2888_s27  ;;  %p2893_p4 = scmp.lt.s32.totalorder %s54_s19, %s54_s19 }
   0xd   :  { %p2894_p5 = scmp.lt.s32.totalorder %s2892_s28, %s2888_s27 }
   0xf   :  { %p2895_p6 = por %p2894_p5, %p2893_p4 }
  0x11   :  { %p2896_p7 = pnand %p2895_p6, %p2889_p3 }
  0x13   :  { %2899 = shalt.err (!%p2896_p7)
}
  0x14   :  { %56 = dma.hbm_to_vmem [thread:$0]  %s3512_s6, 16, %s54_s19, [#allocation8]  }
  0x15   :  { %s3043_s16 = smov [#allocation10]   ;;  %s3044_s18 = smov [#allocation4]  }
  0x16   :  { %s78_s17 = sshll.u32 %s3043_s16, 4  ;;  %s30_s20 = sshll.u32 %s3044_s18, 4  ;;  %s79_s17 = int_to_ptr.vmem [resolvable:$true] %s78_s17  ;;  %s31_s20 = int_to_ptr.vmem [resolvable:$true] %s30_s20 }
  0x17   :  { %s2900_s23 = scalar_lea.hbm %s3517_s11, 256 }
  0x18   :  { %p2901_p8 = scmp.ne.s32.totalorder %s3517_s11, %s2900_s23  ;;  %p2904_p9 = scmp.lt.u32.totalorder %s2900_s23, %s3517_s11 }
  0x1a   :  { %p2906_p10 = pnand %p2904_p9, %p2901_p8 }
  0x1c   :  { %2909 = shalt.err (!%p2906_p10)
}
  0x1d   :  { %s2910_s6 = scalar_lea.vmem %s79_s17, 256  ;;  %p2915_p12 = scmp.lt.s32.totalorder %s79_s17, %s79_s17 }
  0x1e   :  { %p2911_p11 = scmp.ne.s32.totalorder %s79_s17, %s2910_s6  ;;  %p2916_p13 = scmp.lt.s32.totalorder %s2910_s6, %s2910_s6 }
  0x20   :  { %p2917_p0 = por %p2916_p13, %p2915_p12 }
  0x22   :  { %p2918_p1 = pnand %p2917_p0, %p2911_p11 }
  0x24   :  { %2921 = shalt.err (!%p2918_p1)
}
  0x25   :  { %s3045_s19 = smov 128   ;;  %s3046_s28 = smov 8  }
  0x26   :  { %84 = dma.hbm_to_vmem [thread:$0]  %s3517_s11, 256, %s79_s17, [#allocation11], %s3045_s19, %s3045_s19, %s3046_s28  }
  0x27   :  { %s2922_s21 = scalar_lea.hbm %s3506_s0, 256 }
  0x28   :  { %p2923_p2 = scmp.ne.s32.totalorder %s3506_s0, %s2922_s21  ;;  %p2926_p3 = scmp.lt.u32.totalorder %s2922_s21, %s3506_s0 }
  0x2a   :  { %p2928_p4 = pnand %p2926_p3, %p2923_p2 }
  0x2c   :  { %2931 = shalt.err (!%p2928_p4)
}
  0x2d   :  { %s2932_s26 = scalar_lea.vmem %s31_s20, 256  ;;  %p2937_p6 = scmp.lt.s32.totalorder %s31_s20, %s31_s20 }
  0x2e   :  { %p2933_p5 = scmp.ne.s32.totalorder %s31_s20, %s2932_s26  ;;  %p2938_p7 = scmp.lt.s32.totalorder %s2932_s26, %s2932_s26 }
  0x30   :  { %p2939_p8 = por %p2938_p7, %p2937_p6 }
  0x32   :  { %p2940_p9 = pnand %p2939_p8, %p2933_p5 }
  0x34   :  { %2943 = shalt.err (!%p2940_p9)
}
  0x35   :  { %36 = dma.hbm_to_vmem [thread:$0]  %s3506_s0, 256, %s31_s20, [#allocation5], %s3045_s19, %s3045_s19, %s3046_s28  }
  0x36   :  { %s3047_s27 = smov [#allocation9]   ;;  %s3048_s29 = smov [#allocation12]  }
  0x37   :  { %s69_s6 = sshll.u32 %s3047_s27, 4  ;;  %s91_s30 = sshll.u32 %s3048_s29, 4  ;;  %s70_s6 = int_to_ptr.vmem [resolvable:$true] %s69_s6  ;;  %s92_s30 = int_to_ptr.vmem [resolvable:$true] %s91_s30 }
  0x38   :  { %s2944_s21 = scalar_lea.hbm %s3516_s10, 16 }
  0x39   :  { %p2945_p10 = scmp.ne.s32.totalorder %s3516_s10, %s2944_s21  ;;  %p2948_p11 = scmp.lt.u32.totalorder %s2944_s21, %s3516_s10 }
  0x3b   :  { %p2950_p12 = pnand %p2948_p11, %p2945_p10 }
  0x3d   :  { %2953 = shalt.err (!%p2950_p12)
}
  0x3e   :  { %s2954_s0 = scalar_lea.vmem %s70_s6, 16  ;;  %s2958_s20 = scalar_lea.vmem %s70_s6, 32 }
  0x3f   :  { %p2955_p13 = scmp.ne.s32.totalorder %s70_s6, %s2954_s0  ;;  %p2959_p0 = scmp.lt.s32.totalorder %s70_s6, %s70_s6 }
  0x40   :  { %p2960_p1 = scmp.lt.s32.totalorder %s2958_s20, %s2954_s0 }
  0x42   :  { %p2961_p2 = por %p2960_p1, %p2959_p0 }
  0x44   :  { %p2962_p3 = pnand %p2961_p2, %p2955_p13 }
  0x46   :  { %2965 = shalt.err (!%p2962_p3)
}
  0x47   :  { %72 = dma.hbm_to_vmem [thread:$0]  %s3516_s10, 16, %s70_s6, [#allocation8]  }
  0x48   :  { %s2966_s17 = scalar_lea.hbm %s3518_s12, 16 }
  0x49   :  { %p2967_p4 = scmp.ne.s32.totalorder %s3518_s12, %s2966_s17  ;;  %p2970_p5 = scmp.lt.u32.totalorder %s2966_s17, %s3518_s12 }
  0x4b   :  { %p2972_p6 = pnand %p2970_p5, %p2967_p4 }
  0x4d   :  { %2975 = shalt.err (!%p2972_p6)
}
  0x4e   :  { %s2976_s21 = scalar_lea.vmem %s92_s30, 16  ;;  %s2980_s22 = scalar_lea.vmem %s92_s30, 32 }
  0x4f   :  { %p2977_p7 = scmp.ne.s32.totalorder %s92_s30, %s2976_s21  ;;  %p2981_p8 = scmp.lt.s32.totalorder %s92_s30, %s92_s30 }
  0x50   :  { %p2982_p9 = scmp.lt.s32.totalorder %s2980_s22, %s2976_s21 }
  0x52   :  { %p2983_p10 = por %p2982_p9, %p2981_p8 }
  0x54   :  { %p2984_p11 = pnand %p2983_p10, %p2977_p7 }
  0x56   :  { %2987 = shalt.err (!%p2984_p11)
}
  0x57   :  { %94 = dma.hbm_to_vmem [thread:$0]  %s3518_s12, 16, %s92_s30, [#allocation11]  }
  0x58   :  { %s3049_s23 = smov [#allocation13]   ;;  %s2988_s20 = scalar_lea.hbm %s3520_s14, 16 }
  0x59   :  { %s103_s24 = sshll.u32 %s3049_s23, 4  ;;  %p2989_p12 = scmp.ne.s32.totalorder %s3520_s14, %s2988_s20  ;;  %s104_s24 = int_to_ptr.vmem [resolvable:$true] %s103_s24 }
  0x5a   :  { %p2992_p13 = scmp.lt.u32.totalorder %s2988_s20, %s3520_s14 }
  0x5c   :  { %p2994_p0 = pnand %p2992_p13, %p2989_p12 }
  0x5e   :  { %2997 = shalt.err (!%p2994_p0)
}
  0x5f   :  { %s2998_s17 = scalar_lea.vmem %s104_s24, 16  ;;  %s3002_s12 = scalar_lea.vmem %s104_s24, 32 }
  0x60   :  { %p2999_p1 = scmp.ne.s32.totalorder %s104_s24, %s2998_s17  ;;  %p3003_p2 = scmp.lt.s32.totalorder %s104_s24, %s104_s24 }
  0x61   :  { %p3004_p3 = scmp.lt.s32.totalorder %s3002_s12, %s2998_s17 }
  0x63   :  { %p3005_p4 = por %p3004_p3, %p3003_p2 }
  0x65   :  { %p3006_p5 = pnand %p3005_p4, %p2999_p1 }
  0x67   :  { %3009 = shalt.err (!%p3006_p5)
}
  0x68   :  { %106 = dma.hbm_to_vmem [thread:$0]  %s3520_s14, 16, %s104_s24, [#allocation14]  }
  0x69   :  { %3032 = dma.done.wait [#allocation5], 256  }
  0x6a   :  { %3033 = vsyncadd [#allocation5], 4294967040 }
  0x6b   :  { %3034 = dma.done.wait [#allocation8], 32  }
  0x6c   :  { %3035 = vsyncadd [#allocation8], 4294967264 }
  0x6d   :  { %3036 = dma.done.wait [#allocation11], 272  }
  0x6e   :  { %3037 = vsyncadd [#allocation11], 4294967024 }
  0x6f   :  { %3038 = dma.done.wait [#allocation14], 16  }
  0x70   :  { %3039 = vsyncadd [#allocation14], 4294967280  ;;  %v3050_v0 = vmov 0.0|0.0   ;;  %vm3051_vm0 = vmmov 0   ;;  %v3052_v1 = vmov 0.0   ;;  %vm136_vm1 = vcmask 130048  }
  0x71   :  { %2620 = vmatprep.subr.bf16.mxu1 %v3050_v0  ;;  %2412 = vmatprep.mubr.msk.f32.mxu1 %vm3051_vm0, %v3052_v1  ;;  %v127_v2 = vld [vmem:[%s3507_s1] sm:$0xff]  ;;  %v128_v3 = vld [vmem:[%s3507_s1 + $0x8] sm:$0xff]  ;;  %v222_v9 = vld [vmem:[%s3508_s2 + $0x10] sm:$0xff]  ;;  %vm227_vm2 = vcmask 261120   ;;  %s3053_s28 = smov 64   ;;  %vm334_vm3 = vcmask 254976  }
  0x72   :  { %v125_v4 = vld [vmem:[#allocation4] sm:$0xff]  ;;  %v2616_v5 = vpack.c.bf16 %v128_v3, %v127_v2  ;;  %v221_v7 = vld [vmem:[%s3508_s2 + $0x8] sm:$0xff]  ;;  %v223_v10 = vld [vmem:[%s3508_s2 + $0x18] sm:$0xff]  ;;  %s3055_s27 = smov [#allocation15]   ;;  %vm2230_vm4 = vcmask 33792  }
  0x73   :  { %2401 = vmatprep.mubr.msk.f32.mxu0 %vm136_vm1, %v125_v4  ;;  %v220_v6 = vld [vmem:[%s3508_s2] sm:$0xff]  ;;  %v126_v11 = vld [vmem:[#allocation4 + $0x8] sm:$0xff]  ;;  %v3233_v12 = vpack.c.bf16 %v223_v10, %v222_v9  ;;  %s2238_s29 = sshll.u32 %s3055_s27, 4  ;;  %s2239_s29 = int_to_ptr.vmem [resolvable:$true] %s2238_s29 }
  0x74   :  { %v3224_v8 = vpack.c.bf16 %v221_v7, %v220_v6  ;;  %2617 = vmatprep.subr.bf16.mxu0 %v2616_v5  ;;  %v224_v13 = vld [vmem:[%s3513_s7] sm:$0x3]  ;;  %s3010_s16 = scalar_lea.vmem %s2239_s29, 32  ;;  %p3015_p7 = scmp.lt.s32.totalorder %s2239_s29, %s2239_s29 }
  0x75   :  { %2619 = vmatpush3.bf16.msra.mxu0 %v2616_v5  ;;  %v2250_v14 = vld [vmem:[%s3509_s3] ss:$0 sm:$0xff]  ;;  %s3054_s3 = smov 32   ;;  %p3011_p6 = scmp.ne.s32.totalorder %s2239_s29, %s3010_s16 }
  0x76   :  { %2622 = vmatpush3.bf16.msra.mxu1 %v3224_v8  ;;  %2626 = vmatprep.subr.bf16.mxu0 %v3050_v0  ;;  %v225_v24 = vld [vmem:[%s3514_s8] sm:$0x3]  ;;  %p3016_p8 = scmp.lt.s32.totalorder %s3010_s16, %s3010_s16 }
  0x77   :  { %2623 = vmatprep.subr.bf16.mxu1 %v3050_v0 }
  0x78   :  { %2402 = vmatmul.mubr.msk.f32.vlgmr.msra.gmra.mrb[0].mxu0 %vm136_vm1, %v126_v11  ;;  %p3017_p9 = por %p3016_p8, %p3015_p7 }
  0x79   :  { %2628 = vmatpush3.bf16.msra.mxu0 %v3224_v8  ;;  %2423 = vmatprep.mubr.msk.f32.mxu0 %vm3051_vm0, %v3052_v1 }
  0x7a   :  { %2625 = vmatpush3.bf16.msra.mxu1 %v3233_v12  ;;  %2629 = vmatprep.subr.bf16.mxu0 %v3050_v0  ;;  %p3018_p10 = pnand %p3017_p9, %p3011_p6 }
  0x7b   :  { %2632 = vmatprep.subr.bf16.mxu1 %v3050_v0 }
  0x7d   :  { %2413 = vmatmul.mubr.msk.f32.vlgmr.msra.gmra.mrb[0].mxu1 %vm227_vm2, %v224_v13  ;;  %2631 = vmatpush3.bf16.msra.mxu0 %v3233_v12 }
  0x7e   :  { %2634 = vmatpush3.bf16.msra.mxu1 %v3224_v8  ;;  %2434 = vmatprep.mubr.msk.f32.mxu1 %vm3051_vm0, %v3052_v1 }
  0x7f   :  { %2635 = vmatprep.subr.bf16.mxu1 %v3050_v0  ;;  %2638 = vmatprep.subr.bf16.mxu0 %v3050_v0 }
  0x82   :  { %2637 = vmatpush3.bf16.msra.mxu1 %v3233_v12 }
  0x83   :  { %2644 = vmatprep.subr.bf16.mxu1 %v3050_v0 }
 0x14b   :  { %v2403_v15 = vpop.f32.mrb[0].mxu0 }
 0x14c   :  { %v215_v16 = vadd.f32 %v2403_v15, %v2250_v14  ;;  %v209_v17 = vpop.f32.mrb[1].mxu0 }
 0x14d   :  { %v210_v18 = vadd.f32 %v2250_v14, %v209_v17 }
 0x14e   :  { %219 = vst [vmem:[#allocation2 + $0x8] sm:$0xff] %v215_v16 }
 0x14f   :  { %218 = vst [vmem:[#allocation2] sm:$0xff] %v210_v18 }
 0x150   :  { %v297_v19 = vpop.f32.mrb[0].mxu1 }
 0x151   :  { %v2414_v20 = vpop.f32.mrb[1].mxu1 }
 0x156   :  { %v226_v21 = vld [vmem:[#allocation2] ss:$8 sm:$0x3]  ;;  %v337_v39 = vld [vmem:[#allocation2 + $0x1] ss:$8 sm:$0x3] }
 0x157   :  { %v301_v22 = vadd.f32 %v297_v19, %v226_v21  ;;  %v441_v57 = vld [vmem:[#allocation2 + $0x2] ss:$8 sm:$0x3]  ;;  %v545_v15 = vld [vmem:[#allocation2 + $0x3] ss:$8 sm:$0x3] }
 0x159   :  { %2750 = vtanh.f32 %v301_v22  ;;  %v2254_v25 = vmul.f32 -1.442695, %v301_v22 }
 0x15b   :  { %2752 = vpow2.f32 %v2254_v25 }
 0x163   :  { %v2751_v23 = vpop.eup %2750 }
 0x164   :  { %315 = vrot.lane.b32.xlu0 %v2751_v23, %s3053_s28 }
 0x165   :  { %v2753_v26 = vpop.eup %2752 }
 0x166   :  { %v305_v27 = vadd.f32 1.0, %v2753_v26 }
 0x168   :  { %310 = vrot.lane.b32.xlu0 %v225_v24, %s3054_s3  ;;  %2754 = vrcp.f32 %v305_v27 }
 0x172   :  { %v2755_v28 = vpop.eup %2754 }
 0x1d6   :  { %v316_v29 = vpop.permute.xlu0 %315 }
 0x1d7   :  { %v318_v30 = vmul.f32 %v2755_v28, %v316_v29 }
 0x1d9   :  { %320 = vrot.lane.b32.xlu1 %v318_v30, %s3054_s3 }
 0x1da   :  { %v311_v31 = vpop.permute.xlu0 %310 }
 0x1db   :  { %v313_v32 = vmul.f32 %v2755_v28, %v311_v31 }
 0x24b   :  { %v321_v33 = vpop.permute.xlu1 %320 }
 0x24c   :  { %v323_v34 = vadd.f32 %v321_v33, %v313_v32  ;;  %v649_v33 = vld [vmem:[#allocation2 + $0x4] ss:$8 sm:$0x3] }
 0x24e   :  { %2756 = vtanh.f32 %v323_v34 }
 0x258   :  { %v2757_v35 = vpop.eup %2756 }
 0x259   :  { %326 = vrot.lane.b32.xlu1 %v2757_v35, %s3053_s28 }
 0x2cb   :  { %v327_v36 = vpop.permute.xlu1 %326 }
 0x2cc   :  { %v329_v37 = vmul.f32 %v2755_v28, %v327_v36 }
 0x2ce   :  { %331 = vrot.lane.b32.xlu0 %v329_v37, %s3054_s3 }
 0x340   :  { %v332_v38 = vpop.permute.xlu0 %331 }
 0x341   :  { %335 = vst.msk [vmem:[#allocation3] sm:$0x3] %vm334_vm3, %v332_v38  ;;  %2424 = vmatmul.mubr.msk.f32.vlgmr.msra.gmra.mrb[2].mxu0 %vm227_vm2, %v332_v38 }
 0x342   :  { %2640 = vmatpush3.bf16.msra.mxu0 %v3224_v8  ;;  %2445 = vmatprep.mubr.msk.f32.mxu0 %vm3051_vm0, %v3052_v1 }
 0x343   :  { %2641 = vmatprep.subr.bf16.mxu0 %v3050_v0 }
 0x346   :  { %2643 = vmatpush3.bf16.msra.mxu0 %v3233_v12 }
 0x347   :  { %2650 = vmatprep.subr.bf16.mxu0 %v3050_v0 }
 0x414   :  { %v406_v40 = vpop.f32.mrb[2].mxu0 }
 0x415   :  { %v410_v41 = vadd.f32 %v406_v40, %v337_v39  ;;  %v2425_v42 = vpop.f32.mrb[3].mxu0 }
 0x417   :  { %2758 = vtanh.f32 %v410_v41  ;;  %v2256_v44 = vmul.f32 -1.442695, %v410_v41 }
 0x419   :  { %2760 = vpow2.f32 %v2256_v44 }
 0x421   :  { %v2759_v43 = vpop.eup %2758 }
 0x422   :  { %420 = vrot.lane.b32.xlu1 %v2759_v43, %s3053_s28 }
 0x423   :  { %v2761_v45 = vpop.eup %2760 }
 0x424   :  { %v414_v46 = vadd.f32 1.0, %v2761_v45 }
 0x426   :  { %2762 = vrcp.f32 %v414_v46 }
 0x430   :  { %v2763_v47 = vpop.eup %2762 }
 0x431   :  { %v418_v50 = vmul.f32 %v2763_v47, %v323_v34 }
 0x494   :  { %v421_v48 = vpop.permute.xlu1 %420 }
 0x495   :  { %v423_v49 = vmul.f32 %v2763_v47, %v421_v48 }
 0x497   :  { %425 = vrot.lane.b32.xlu0 %v423_v49, %s3054_s3 }
 0x509   :  { %v426_v51 = vpop.permute.xlu0 %425 }
 0x50a   :  { %v428_v52 = vadd.f32 %v426_v51, %v418_v50  ;;  %v753_v51 = vld [vmem:[#allocation2 + $0x5] ss:$8 sm:$0x3] }
 0x50c   :  { %2764 = vtanh.f32 %v428_v52 }
 0x516   :  { %v2765_v53 = vpop.eup %2764 }
 0x517   :  { %431 = vrot.lane.b32.xlu1 %v2765_v53, %s3053_s28 }
 0x589   :  { %v432_v54 = vpop.permute.xlu1 %431 }
 0x58a   :  { %v434_v55 = vmul.f32 %v2763_v47, %v432_v54 }
 0x58c   :  { %436 = vrot.lane.b32.xlu0 %v434_v55, %s3054_s3 }
 0x5fe   :  { %v437_v56 = vpop.permute.xlu0 %436 }
 0x5ff   :  { %439 = vst.msk [vmem:[#allocation3 + $0x2] sm:$0x3] %vm334_vm3, %v437_v56  ;;  %2435 = vmatmul.mubr.msk.f32.vlgmr.msra.gmra.mrb[2].mxu1 %vm227_vm2, %v437_v56 }
 0x600   :  { %2646 = vmatpush3.bf16.msra.mxu1 %v3224_v8  ;;  %2456 = vmatprep.mubr.msk.f32.mxu1 %vm3051_vm0, %v3052_v1 }
 0x601   :  { %2647 = vmatprep.subr.bf16.mxu1 %v3050_v0 }
 0x604   :  { %2649 = vmatpush3.bf16.msra.mxu1 %v3233_v12 }
 0x605   :  { %2656 = vmatprep.subr.bf16.mxu1 %v3050_v0 }
 0x6d2   :  { %v510_v58 = vpop.f32.mrb[2].mxu1 }
 0x6d3   :  { %v514_v59 = vadd.f32 %v510_v58, %v441_v57  ;;  %v2436_v60 = vpop.f32.mrb[3].mxu1 }
 0x6d5   :  { %2766 = vtanh.f32 %v514_v59  ;;  %v2258_v62 = vmul.f32 -1.442695, %v514_v59 }
 0x6d7   :  { %2768 = vpow2.f32 %v2258_v62 }
 0x6df   :  { %v2767_v61 = vpop.eup %2766 }
 0x6e0   :  { %524 = vrot.lane.b32.xlu1 %v2767_v61, %s3053_s28 }
 0x6e1   :  { %v2769_v63 = vpop.eup %2768 }
 0x6e2   :  { %v518_v2 = vadd.f32 1.0, %v2769_v63 }
 0x6e4   :  { %2770 = vrcp.f32 %v518_v2 }
 0x6ee   :  { %v2771_v3 = vpop.eup %2770 }
 0x6ef   :  { %v522_v6 = vmul.f32 %v2771_v3, %v428_v52 }
 0x752   :  { %v525_v4 = vpop.permute.xlu1 %524 }
 0x753   :  { %v527_v5 = vmul.f32 %v2771_v3, %v525_v4 }
 0x755   :  { %529 = vrot.lane.b32.xlu0 %v527_v5, %s3054_s3 }
 0x7c7   :  { %v530_v7 = vpop.permute.xlu0 %529 }
 0x7c8   :  { %v532_v9 = vadd.f32 %v530_v7, %v522_v6  ;;  %v857_v6 = vld [vmem:[#allocation2 + $0x6] ss:$8 sm:$0x3] }
 0x7ca   :  { %2772 = vtanh.f32 %v532_v9 }
 0x7d4   :  { %v2773_v10 = vpop.eup %2772 }
 0x7d5   :  { %535 = vrot.lane.b32.xlu1 %v2773_v10, %s3053_s28 }
 0x847   :  { %v536_v11 = vpop.permute.xlu1 %535 }
 0x848   :  { %v538_v13 = vmul.f32 %v2771_v3, %v536_v11 }
 0x84a   :  { %540 = vrot.lane.b32.xlu0 %v538_v13, %s3054_s3 }
 0x8bc   :  { %v541_v14 = vpop.permute.xlu0 %540 }
 0x8bd   :  { %543 = vst.msk [vmem:[#allocation3 + $0x4] sm:$0x3] %vm334_vm3, %v541_v14  ;;  %2446 = vmatmul.mubr.msk.f32.vlgmr.msra.gmra.mrb[4].mxu0 %vm227_vm2, %v541_v14 }
 0x8be   :  { %2652 = vmatpush3.bf16.msra.mxu0 %v3224_v8  ;;  %2467 = vmatprep.mubr.msk.f32.mxu0 %vm3051_vm0, %v3052_v1 }
 0x8bf   :  { %2653 = vmatprep.subr.bf16.mxu0 %v3050_v0 }
 0x8c2   :  { %2655 = vmatpush3.bf16.msra.mxu0 %v3233_v12 }
 0x8c3   :  { %2662 = vmatprep.subr.bf16.mxu0 %v3050_v0 }
 0x990   :  { %v614_v16 = vpop.f32.mrb[4].mxu0 }
 0x991   :  { %v618_v17 = vadd.f32 %v614_v16, %v545_v15  ;;  %v2447_v18 = vpop.f32.mrb[5].mxu0 }
 0x993   :  { %2774 = vtanh.f32 %v618_v17  ;;  %v2260_v20 = vmul.f32 -1.442695, %v618_v17 }
 0x995   :  { %2776 = vpow2.f32 %v2260_v20 }
 0x99d   :  { %v2775_v19 = vpop.eup %2774 }
 0x99e   :  { %628 = vrot.lane.b32.xlu1 %v2775_v19, %s3053_s28 }
 0x99f   :  { %v2777_v21 = vpop.eup %2776 }
 0x9a0   :  { %v622_v22 = vadd.f32 1.0, %v2777_v21 }
 0x9a2   :  { %2778 = vrcp.f32 %v622_v22 }
 0x9ac   :  { %v2779_v23 = vpop.eup %2778 }
 0x9ad   :  { %v626_v26 = vmul.f32 %v2779_v23, %v532_v9 }
 0xa10   :  { %v629_v24 = vpop.permute.xlu1 %628 }
 0xa11   :  { %v631_v25 = vmul.f32 %v2779_v23, %v629_v24 }
 0xa13   :  { %633 = vrot.lane.b32.xlu0 %v631_v25, %s3054_s3 }
 0xa85   :  { %v634_v27 = vpop.permute.xlu0 %633 }
 0xa86   :  { %v636_v28 = vadd.f32 %v634_v27, %v626_v26  ;;  %v961_v26 = vld [vmem:[#allocation2 + $0x7] ss:$8 sm:$0x3] }
 0xa88   :  { %2780 = vtanh.f32 %v636_v28 }
 0xa92   :  { %v2781_v29 = vpop.eup %2780 }
 0xa93   :  { %639 = vrot.lane.b32.xlu1 %v2781_v29, %s3053_s28 }
 0xb05   :  { %v640_v30 = vpop.permute.xlu1 %639 }
 0xb06   :  { %v642_v31 = vmul.f32 %v2779_v23, %v640_v30 }
 0xb08   :  { %644 = vrot.lane.b32.xlu0 %v642_v31, %s3054_s3 }
 0xb7a   :  { %v645_v32 = vpop.permute.xlu0 %644 }
 0xb7b   :  { %647 = vst.msk [vmem:[#allocation3 + $0x6] sm:$0x3] %vm334_vm3, %v645_v32  ;;  %2457 = vmatmul.mubr.msk.f32.vlgmr.msra.gmra.mrb[4].mxu1 %vm227_vm2, %v645_v32 }
 0xb7c   :  { %2658 = vmatpush3.bf16.msra.mxu1 %v3224_v8  ;;  %2478 = vmatprep.mubr.msk.f32.mxu1 %vm3051_vm0, %v3052_v1 }
 0xb7d   :  { %2659 = vmatprep.subr.bf16.mxu1 %v3050_v0 }
 0xb80   :  { %2661 = vmatpush3.bf16.msra.mxu1 %v3233_v12 }
 0xb82   :  { %v1064_v5 = vld [vmem:[#allocation3] sm:$0xff] }
 0xc4e   :  { %v718_v34 = vpop.f32.mrb[4].mxu1 }
 0xc4f   :  { %v722_v35 = vadd.f32 %v718_v34, %v649_v33  ;;  %v2458_v36 = vpop.f32.mrb[5].mxu1 }
 0xc51   :  { %2782 = vtanh.f32 %v722_v35  ;;  %v2262_v38 = vmul.f32 -1.442695, %v722_v35 }
 0xc53   :  { %2784 = vpow2.f32 %v2262_v38 }
 0xc5b   :  { %v2783_v37 = vpop.eup %2782 }
 0xc5c   :  { %732 = vrot.lane.b32.xlu1 %v2783_v37, %s3053_s28 }
 0xc5d   :  { %v2785_v39 = vpop.eup %2784 }
 0xc5e   :  { %v726_v40 = vadd.f32 1.0, %v2785_v39 }
 0xc60   :  { %2786 = vrcp.f32 %v726_v40 }
 0xc6a   :  { %v2787_v41 = vpop.eup %2786 }
 0xc6b   :  { %v730_v44 = vmul.f32 %v2787_v41, %v636_v28 }
 0xcce   :  { %v733_v42 = vpop.permute.xlu1 %732 }
 0xccf   :  { %v735_v43 = vmul.f32 %v2787_v41, %v733_v42  ;;  %v1067_v42 = vld [vmem:[%s3510_s4 + $0x8] sm:$0xff] }
 0xcd1   :  { %737 = vrot.lane.b32.xlu0 %v735_v43, %s3054_s3  ;;  %v1068_v43 = vld [vmem:[%s3510_s4 + $0x10] sm:$0xff] }
 0xd43   :  { %v738_v45 = vpop.permute.xlu0 %737 }
 0xd44   :  { %v740_v46 = vadd.f32 %v738_v45, %v730_v44  ;;  %v1069_v45 = vld [vmem:[%s3510_s4 + $0x18] sm:$0xff] }
 0xd46   :  { %2788 = vtanh.f32 %v740_v46 }
 0xd50   :  { %v2789_v47 = vpop.eup %2788 }
 0xd51   :  { %743 = vrot.lane.b32.xlu1 %v2789_v47, %s3053_s28  ;;  %v1160_v47 = vld [vmem:[%s3511_s5] sm:$0xff] }
 0xdc3   :  { %v744_v48 = vpop.permute.xlu1 %743 }
 0xdc4   :  { %v746_v49 = vmul.f32 %v2787_v41, %v744_v48  ;;  %v1066_v41 = vld [vmem:[%s3510_s4] sm:$0xff]  ;;  %v1161_v48 = vld [vmem:[%s3511_s5 + $0x8] sm:$0xff] }
 0xdc5   :  { %v2668_v44 = vpack.c.bf16 %v1067_v42, %v1066_v41 }
 0xdc6   :  { %748 = vrot.lane.b32.xlu0 %v746_v49, %s3054_s3  ;;  %v1162_v49 = vld [vmem:[%s3511_s5 + $0x10] sm:$0xff] }
 0xdc7   :  { %2669 = vmatprep.subr.bf16.mxu1 %v2668_v44 }
 0xe38   :  { %v749_v50 = vpop.permute.xlu0 %748 }
 0xe39   :  { %751 = vst.msk [vmem:[#allocation3 + $0x8] sm:$0x3] %vm334_vm3, %v749_v50  ;;  %2468 = vmatmul.mubr.msk.f32.vlgmr.msra.gmra.mrb[6].mxu0 %vm227_vm2, %v749_v50  ;;  %v3361_v50 = vpack.c.bf16 %v1161_v48, %v1160_v47 }
 0xe3a   :  { %2664 = vmatpush3.bf16.msra.mxu0 %v3224_v8  ;;  %2489 = vmatprep.mubr.msk.f32.mxu0 %vm3051_vm0, %v3052_v1 }
 0xe3b   :  { %2665 = vmatprep.subr.bf16.mxu0 %v3050_v0 }
 0xe3e   :  { %2667 = vmatpush3.bf16.msra.mxu0 %v3233_v12 }
 0xe3f   :  { %2676 = vmatprep.subr.bf16.mxu0 %v3050_v0 }
 0xf0c   :  { %v822_v52 = vpop.f32.mrb[6].mxu0 }
 0xf0d   :  { %v826_v53 = vadd.f32 %v822_v52, %v753_v51  ;;  %v2469_v54 = vpop.f32.mrb[7].mxu0  ;;  %v1163_v51 = vld [vmem:[%s3511_s5 + $0x18] sm:$0xff] }
 0xf0e   :  { %v3368_v54 = vpack.c.bf16 %v1163_v51, %v1162_v49 }
 0xf0f   :  { %2790 = vtanh.f32 %v826_v53  ;;  %v2264_v56 = vmul.f32 -1.442695, %v826_v53 }
 0xf11   :  { %2792 = vpow2.f32 %v2264_v56  ;;  %v2272_v56 = vld [vmem:[%s3513_s7 + $0x2] sm:$0x3] }
 0xf19   :  { %v2791_v55 = vpop.eup %2790 }
 0xf1a   :  { %836 = vrot.lane.b32.xlu1 %v2791_v55, %s3053_s28  ;;  %v2273_v55 = vld [vmem:[%s3514_s8 + $0x2] sm:$0x3] }
 0xf1b   :  { %v2793_v8 = vpop.eup %2792 }
 0xf1c   :  { %v830_v57 = vadd.f32 1.0, %v2793_v8 }
 0xf1e   :  { %2794 = vrcp.f32 %v830_v57 }
 0xf28   :  { %v2795_v58 = vpop.eup %2794 }
 0xf29   :  { %v834_v12 = vmul.f32 %v2795_v58, %v740_v46  ;;  %v2672_v46 = vpack.c.bf16 %v1069_v45, %v1068_v43 }
 0xf8c   :  { %v837_v59 = vpop.permute.xlu1 %836 }
 0xf8d   :  { %v839_v60 = vmul.f32 %v2795_v58, %v837_v59 }
 0xf8f   :  { %841 = vrot.lane.b32.xlu0 %v839_v60, %s3054_s3  ;;  %v2269_v60 = vld [vmem:[#allocation7] ss:$0 sm:$0xff] }
0x1001   :  { %v842_v61 = vpop.permute.xlu0 %841 }
0x1002   :  { %v844_v62 = vadd.f32 %v842_v61, %v834_v12 }
0x1004   :  { %2796 = vtanh.f32 %v844_v62 }
0x100e   :  { %v2797_v63 = vpop.eup %2796 }
0x100f   :  { %847 = vrot.lane.b32.xlu1 %v2797_v63, %s3053_s28 }
0x1081   :  { %v848_v2 = vpop.permute.xlu1 %847 }
0x1082   :  { %v850_v3 = vmul.f32 %v2795_v58, %v848_v2 }
0x1084   :  { %852 = vrot.lane.b32.xlu0 %v850_v3, %s3054_s3 }
0x10f6   :  { %v853_v4 = vpop.permute.xlu0 %852 }
0x10f7   :  { %855 = vst.msk [vmem:[#allocation3 + $0xa] sm:$0x3] %vm334_vm3, %v853_v4  ;;  %2479 = vmatmul.mubr.msk.f32.vlgmr.msra.gmra.mrb[6].mxu1 %vm227_vm2, %v853_v4 }
0x10f8   :  { %2500 = vmatprep.mubr.msk.f32.mxu1 %vm227_vm2, %v1064_v5  ;;  %2671 = vmatpush3.bf16.msra.mxu1 %v2668_v44 }
0x10f9   :  { %2673 = vmatprep.subr.bf16.mxu1 %v2672_v46 }
0x10fc   :  { %2675 = vmatpush3.bf16.msra.mxu1 %v2672_v46 }
0x10fd   :  { %2682 = vmatprep.subr.bf16.mxu1 %v3050_v0 }
0x11ca   :  { %v926_v7 = vpop.f32.mrb[6].mxu1 }
0x11cb   :  { %v930_v9 = vadd.f32 %v926_v7, %v857_v6  ;;  %v2480_v10 = vpop.f32.mrb[7].mxu1 }
0x11cd   :  { %2798 = vtanh.f32 %v930_v9  ;;  %v2266_v13 = vmul.f32 -1.442695, %v930_v9 }
0x11cf   :  { %2800 = vpow2.f32 %v2266_v13 }
0x11d7   :  { %v2799_v11 = vpop.eup %2798 }
0x11d8   :  { %940 = vrot.lane.b32.xlu1 %v2799_v11, %s3053_s28 }
0x11d9   :  { %v2801_v14 = vpop.eup %2800 }
0x11da   :  { %v934_v15 = vadd.f32 1.0, %v2801_v14 }
0x11dc   :  { %2802 = vrcp.f32 %v934_v15 }
0x11e6   :  { %v2803_v16 = vpop.eup %2802 }
0x11e7   :  { %v938_v19 = vmul.f32 %v2803_v16, %v844_v62 }
0x124a   :  { %v941_v17 = vpop.permute.xlu1 %940 }
0x124b   :  { %v943_v18 = vmul.f32 %v2803_v16, %v941_v17 }
0x124d   :  { %945 = vrot.lane.b32.xlu0 %v943_v18, %s3054_s3 }
0x12bf   :  { %v946_v20 = vpop.permute.xlu0 %945 }
0x12c0   :  { %v948_v21 = vadd.f32 %v946_v20, %v938_v19 }
0x12c2   :  { %2804 = vtanh.f32 %v948_v21 }
0x12cc   :  { %v2805_v22 = vpop.eup %2804 }
0x12cd   :  { %951 = vrot.lane.b32.xlu1 %v2805_v22, %s3053_s28 }
0x133f   :  { %v952_v23 = vpop.permute.xlu1 %951 }
0x1340   :  { %v954_v24 = vmul.f32 %v2803_v16, %v952_v23 }
0x1342   :  { %956 = vrot.lane.b32.xlu0 %v954_v24, %s3054_s3 }
0x13b4   :  { %v957_v25 = vpop.permute.xlu0 %956 }
0x13b5   :  { %959 = vst.msk [vmem:[#allocation3 + $0xc] sm:$0x3] %vm334_vm3, %v957_v25  ;;  %2490 = vmatmul.mubr.msk.f32.vlgmr.msra.gmra.mrb[8].mxu0 %vm227_vm2, %v957_v25 }
0x13b6   :  { %2511 = vmatprep.mubr.msk.f32.mxu0 %vm3051_vm0, %v3052_v1  ;;  %2678 = vmatpush3.bf16.msra.mxu0 %v3361_v50 }
0x13b7   :  { %2679 = vmatprep.subr.bf16.mxu0 %v3050_v0 }
0x13ba   :  { %2681 = vmatpush3.bf16.msra.mxu0 %v3368_v54 }
0x13bb   :  { %2688 = vmatprep.subr.bf16.mxu0 %v3050_v0 }
0x13bd   :  { %2512 = vmatmul.mubr.msk.f32.vlgmr.msra.gmra.mrb[10].mxu0 %vm227_vm2, %v2272_v56 }
0x13be   :  { %2690 = vmatpush3.bf16.msra.mxu0 %v3361_v50  ;;  %2533 = vmatprep.mubr.msk.f32.mxu0 %vm3051_vm0, %v3052_v1 }
0x13bf   :  { %2691 = vmatprep.subr.bf16.mxu0 %v3050_v0 }
0x13c2   :  { %2693 = vmatpush3.bf16.msra.mxu0 %v3368_v54 }
0x13c3   :  { %2700 = vmatprep.subr.bf16.mxu0 %v3050_v0 }
0x1488   :  { %v1030_v27 = vpop.f32.mrb[8].mxu0 }
0x1489   :  { %v1034_v28 = vadd.f32 %v1030_v27, %v961_v26  ;;  %v2491_v29 = vpop.f32.mrb[9].mxu0 }
0x148b   :  { %2806 = vtanh.f32 %v1034_v28  ;;  %v2268_v31 = vmul.f32 -1.442695, %v1034_v28 }
0x148d   :  { %2808 = vpow2.f32 %v2268_v31 }
0x1490   :  { %v1238_v58 = vpop.f32.mrb[10].mxu0 }
0x1491   :  { %v2513_v59 = vpop.f32.mrb[11].mxu0 }
0x1495   :  { %v2807_v30 = vpop.eup %2806 }
0x1496   :  { %1044 = vrot.lane.b32.xlu1 %v2807_v30, %s3053_s28 }
0x1497   :  { %v2809_v32 = vpop.eup %2808 }
0x1498   :  { %v1038_v33 = vadd.f32 1.0, %v2809_v32 }
0x149a   :  { %2810 = vrcp.f32 %v1038_v33 }
0x14a4   :  { %v2811_v34 = vpop.eup %2810 }
0x14a5   :  { %v1042_v37 = vmul.f32 %v2811_v34, %v948_v21 }
0x1508   :  { %v1045_v35 = vpop.permute.xlu1 %1044 }
0x1509   :  { %v1047_v36 = vmul.f32 %v2811_v34, %v1045_v35 }
0x150b   :  { %1049 = vrot.lane.b32.xlu0 %v1047_v36, %s3054_s3 }
0x157d   :  { %v1050_v38 = vpop.permute.xlu0 %1049 }
0x157e   :  { %v1052_v39 = vadd.f32 %v1050_v38, %v1042_v37 }
0x1580   :  { %2812 = vtanh.f32 %v1052_v39 }
0x158a   :  { %v2813_v40 = vpop.eup %2812 }
0x158b   :  { %1055 = vrot.lane.b32.xlu1 %v2813_v40, %s3053_s28 }
0x15fd   :  { %v1056_v52 = vpop.permute.xlu1 %1055 }
0x15fe   :  { %v1058_v53 = vmul.f32 %v2811_v34, %v1056_v52 }
0x1600   :  { %1060 = vrot.lane.b32.xlu0 %v1058_v53, %s3054_s3 }
0x1604   :  { %1251 = vrot.lane.b32.xlu0 %v2273_v55, %s3054_s3 }
0x1672   :  { %v1061_v8 = vpop.permute.xlu0 %1060 }
0x1673   :  { %1063 = vst.msk [vmem:[#allocation3 + $0xe] sm:$0x3] %vm334_vm3, %v1061_v8 }
0x1676   :  { %v1252_v13 = vpop.permute.xlu0 %1251 }
0x167a   :  { %v1065_v57 = vld [vmem:[#allocation3 + $0x8] sm:$0xff] }
0x167b   :  { %2501 = vmatmul.mubr.msk.f32.vlgmr.msra.gmra.mrb[8].mxu1 %vm227_vm2, %v1065_v57 }
0x167c   :  { %2684 = vmatpush3.bf16.msra.mxu1 %v3361_v50  ;;  %2522 = vmatprep.mubr.msk.f32.mxu1 %vm3051_vm0, %v3052_v1 }
0x167d   :  { %2685 = vmatprep.subr.bf16.mxu1 %v3050_v0 }
0x1680   :  { %2687 = vmatpush3.bf16.msra.mxu1 %v3368_v54 }
0x1681   :  { %2694 = vmatprep.subr.bf16.mxu1 %v3050_v0 }
0x174e   :  { %v2502_v12 = vpop.f32.mrb[8].mxu1 }
0x174f   :  { %v1155_v61 = vadd.f32 %v2502_v12, %v2269_v60  ;;  %v1149_v62 = vpop.f32.mrb[9].mxu1 }
0x1750   :  { %v1150_v63 = vadd.f32 %v2269_v60, %v1149_v62 }
0x1751   :  { %1159 = vst [vmem:[#allocation2 + $0x8] sm:$0xff] %v1155_v61 }
0x1752   :  { %1158 = vst [vmem:[#allocation2] sm:$0xff] %v1150_v63 }
0x1759   :  { %v1168_v2 = vld [vmem:[#allocation2] sm:$0x3]  ;;  %v1271_v21 = vld [vmem:[#allocation2 + $0x2] sm:$0x3]  ;;  %v1372_v39 = vld [vmem:[#allocation2 + $0x4] sm:$0x3] }
0x175a   :  { %v1242_v3 = vadd.f32 %v1238_v58, %v1168_v2  ;;  %v1473_v58 = vld [vmem:[#allocation2 + $0x6] sm:$0x3] }
0x175c   :  { %2814 = vtanh.f32 %v1242_v3  ;;  %v2275_v5 = vmul.f32 -1.442695, %v1242_v3 }
0x175e   :  { %2816 = vpow2.f32 %v2275_v5 }
0x1766   :  { %v2815_v4 = vpop.eup %2814 }
0x1767   :  { %1256 = vrot.lane.b32.xlu1 %v2815_v4, %s3053_s28 }
0x1768   :  { %v2817_v6 = vpop.eup %2816 }
0x1769   :  { %v1246_v7 = vadd.f32 1.0, %v2817_v6 }
0x176b   :  { %2818 = vrcp.f32 %v1246_v7 }
0x1775   :  { %v2819_v9 = vpop.eup %2818 }
0x1776   :  { %v1254_v14 = vmul.f32 %v2819_v9, %v1252_v13 }
0x17d9   :  { %v1257_v10 = vpop.permute.xlu1 %1256 }
0x17da   :  { %v1259_v11 = vmul.f32 %v2819_v9, %v1257_v10 }
0x17dc   :  { %1261 = vrot.lane.b32.xlu1 %v1259_v11, %s3054_s3 }
0x184e   :  { %v1262_v15 = vpop.permute.xlu1 %1261 }
0x184f   :  { %v1264_v16 = vadd.f32 %v1262_v15, %v1254_v14  ;;  %v1574_v15 = vld [vmem:[#allocation2 + $0x8] sm:$0x3] }
0x1851   :  { %2820 = vtanh.f32 %v1264_v16 }
0x185b   :  { %v2821_v17 = vpop.eup %2820 }
0x185c   :  { %1267 = vrot.lane.b32.xlu0 %v2821_v17, %s3053_s28 }
0x18ce   :  { %v1268_v18 = vpop.permute.xlu0 %1267 }
0x18cf   :  { %v1270_v19 = vmul.f32 %v2819_v9, %v1268_v18 }
0x18d1   :  { %1273 = vrot.lane.b32.xlu1 %v1270_v19, %s3054_s3 }
0x1943   :  { %v1274_v20 = vpop.permute.xlu1 %1273 }
0x1944   :  { %2523 = vmatmul.mubr.msk.f32.vlgmr.msra.gmra.mrb[10].mxu1 %vm227_vm2, %v1274_v20 }
0x1945   :  { %2696 = vmatpush3.bf16.msra.mxu1 %v3361_v50  ;;  %2544 = vmatprep.mubr.msk.f32.mxu1 %vm3051_vm0, %v3052_v1 }
0x1946   :  { %2697 = vmatprep.subr.bf16.mxu1 %v3050_v0 }
0x1949   :  { %2699 = vmatpush3.bf16.msra.mxu1 %v3368_v54 }
0x194a   :  { %2706 = vmatprep.subr.bf16.mxu1 %v3050_v0 }
0x1a17   :  { %v1343_v22 = vpop.f32.mrb[10].mxu1 }
0x1a18   :  { %v1347_v23 = vadd.f32 %v1343_v22, %v1271_v21  ;;  %v2524_v24 = vpop.f32.mrb[11].mxu1 }
0x1a1a   :  { %2822 = vtanh.f32 %v1347_v23  ;;  %v2277_v26 = vmul.f32 -1.442695, %v1347_v23 }
0x1a1c   :  { %2824 = vpow2.f32 %v2277_v26 }
0x1a24   :  { %v2823_v25 = vpop.eup %2822 }
0x1a25   :  { %1357 = vrot.lane.b32.xlu0 %v2823_v25, %s3053_s28 }
0x1a26   :  { %v2825_v27 = vpop.eup %2824 }
0x1a27   :  { %v1351_v28 = vadd.f32 1.0, %v2825_v27 }
0x1a29   :  { %2826 = vrcp.f32 %v1351_v28 }
0x1a33   :  { %v2827_v29 = vpop.eup %2826 }
0x1a34   :  { %v1355_v32 = vmul.f32 %v2827_v29, %v1264_v16 }
0x1a97   :  { %v1358_v30 = vpop.permute.xlu0 %1357 }
0x1a98   :  { %v1360_v31 = vmul.f32 %v2827_v29, %v1358_v30 }
0x1a9a   :  { %1362 = vrot.lane.b32.xlu1 %v1360_v31, %s3054_s3 }
0x1b0c   :  { %v1363_v33 = vpop.permute.xlu1 %1362 }
0x1b0d   :  { %v1365_v34 = vadd.f32 %v1363_v33, %v1355_v32  ;;  %v1675_v33 = vld [vmem:[#allocation2 + $0xa] sm:$0x3] }
0x1b0f   :  { %2828 = vtanh.f32 %v1365_v34 }
0x1b19   :  { %v2829_v35 = vpop.eup %2828 }
0x1b1a   :  { %1368 = vrot.lane.b32.xlu0 %v2829_v35, %s3053_s28 }
0x1b8c   :  { %v1369_v36 = vpop.permute.xlu0 %1368 }
0x1b8d   :  { %v1371_v37 = vmul.f32 %v2827_v29, %v1369_v36 }
0x1b8f   :  { %1374 = vrot.lane.b32.xlu1 %v1371_v37, %s3054_s3 }
0x1c01   :  { %v1375_v38 = vpop.permute.xlu1 %1374 }
0x1c02   :  { %2534 = vmatmul.mubr.msk.f32.vlgmr.msra.gmra.mrb[12].mxu0 %vm227_vm2, %v1375_v38 }
0x1c03   :  { %2702 = vmatpush3.bf16.msra.mxu0 %v3361_v50  ;;  %2555 = vmatprep.mubr.msk.f32.mxu0 %vm3051_vm0, %v3052_v1 }
0x1c04   :  { %2703 = vmatprep.subr.bf16.mxu0 %v3050_v0 }
0x1c07   :  { %2705 = vmatpush3.bf16.msra.mxu0 %v3368_v54 }
0x1c08   :  { %2712 = vmatprep.subr.bf16.mxu0 %v3050_v0 }
0x1cd5   :  { %v1444_v40 = vpop.f32.mrb[12].mxu0 }
0x1cd6   :  { %v1448_v41 = vadd.f32 %v1444_v40, %v1372_v39  ;;  %v2535_v42 = vpop.f32.mrb[13].mxu0 }
0x1cd8   :  { %2830 = vtanh.f32 %v1448_v41  ;;  %v2279_v44 = vmul.f32 -1.442695, %v1448_v41 }
0x1cda   :  { %2832 = vpow2.f32 %v2279_v44 }
0x1ce2   :  { %v2831_v43 = vpop.eup %2830 }
0x1ce3   :  { %1458 = vrot.lane.b32.xlu0 %v2831_v43, %s3053_s28 }
0x1ce4   :  { %v2833_v45 = vpop.eup %2832 }
0x1ce5   :  { %v1452_v46 = vadd.f32 1.0, %v2833_v45 }
0x1ce7   :  { %2834 = vrcp.f32 %v1452_v46 }
0x1cf1   :  { %v2835_v47 = vpop.eup %2834 }
0x1cf2   :  { %v1456_v51 = vmul.f32 %v2835_v47, %v1365_v34 }
0x1d55   :  { %v1459_v48 = vpop.permute.xlu0 %1458 }
0x1d56   :  { %v1461_v49 = vmul.f32 %v2835_v47, %v1459_v48 }
0x1d58   :  { %1463 = vrot.lane.b32.xlu1 %v1461_v49, %s3054_s3  ;;  %v1776_v49 = vld [vmem:[#allocation2 + $0xc] sm:$0x3] }
0x1dca   :  { %v1464_v52 = vpop.permute.xlu1 %1463 }
0x1dcb   :  { %v1466_v53 = vadd.f32 %v1464_v52, %v1456_v51 }
0x1dcd   :  { %2836 = vtanh.f32 %v1466_v53 }
0x1dd7   :  { %v2837_v55 = vpop.eup %2836 }
0x1dd8   :  { %1469 = vrot.lane.b32.xlu0 %v2837_v55, %s3053_s28 }
0x1e4a   :  { %v1470_v56 = vpop.permute.xlu0 %1469 }
0x1e4b   :  { %v1472_v8 = vmul.f32 %v2835_v47, %v1470_v56 }
0x1e4d   :  { %1475 = vrot.lane.b32.xlu1 %v1472_v8, %s3054_s3 }
0x1ebf   :  { %v1476_v57 = vpop.permute.xlu1 %1475 }
0x1ec0   :  { %2545 = vmatmul.mubr.msk.f32.vlgmr.msra.gmra.mrb[12].mxu1 %vm227_vm2, %v1476_v57 }
0x1ec1   :  { %2708 = vmatpush3.bf16.msra.mxu1 %v3361_v50  ;;  %2566 = vmatprep.mubr.msk.f32.mxu1 %vm3051_vm0, %v3052_v1 }
0x1ec2   :  { %2709 = vmatprep.subr.bf16.mxu1 %v3050_v0 }
0x1ec5   :  { %2711 = vmatpush3.bf16.msra.mxu1 %v3368_v54 }
0x1ec6   :  { %2718 = vmatprep.subr.bf16.mxu1 %v3050_v0 }
0x1f93   :  { %v1545_v59 = vpop.f32.mrb[12].mxu1 }
0x1f94   :  { %v1549_v60 = vadd.f32 %v1545_v59, %v1473_v58  ;;  %v2546_v12 = vpop.f32.mrb[13].mxu1 }
0x1f96   :  { %2838 = vtanh.f32 %v1549_v60  ;;  %v2281_v62 = vmul.f32 -1.442695, %v1549_v60 }
0x1f98   :  { %2840 = vpow2.f32 %v2281_v62 }
0x1fa0   :  { %v2839_v61 = vpop.eup %2838 }
0x1fa1   :  { %1559 = vrot.lane.b32.xlu0 %v2839_v61, %s3053_s28 }
0x1fa2   :  { %v2841_v63 = vpop.eup %2840 }
0x1fa3   :  { %v1553_v2 = vadd.f32 1.0, %v2841_v63 }
0x1fa5   :  { %2842 = vrcp.f32 %v1553_v2 }
0x1faf   :  { %v2843_v3 = vpop.eup %2842 }
0x1fb0   :  { %v1557_v6 = vmul.f32 %v2843_v3, %v1466_v53 }
0x2013   :  { %v1560_v4 = vpop.permute.xlu0 %1559 }
0x2014   :  { %v1562_v5 = vmul.f32 %v2843_v3, %v1560_v4 }
0x2016   :  { %1564 = vrot.lane.b32.xlu1 %v1562_v5, %s3054_s3  ;;  %v1877_v5 = vld [vmem:[#allocation2 + $0xe] sm:$0x3] }
0x2088   :  { %v1565_v7 = vpop.permute.xlu1 %1564 }
0x2089   :  { %v1567_v9 = vadd.f32 %v1565_v7, %v1557_v6 }
0x208b   :  { %2844 = vtanh.f32 %v1567_v9 }
0x2095   :  { %v2845_v10 = vpop.eup %2844 }
0x2096   :  { %1570 = vrot.lane.b32.xlu0 %v2845_v10, %s3053_s28 }
0x2108   :  { %v1571_v11 = vpop.permute.xlu0 %1570 }
0x2109   :  { %v1573_v13 = vmul.f32 %v2843_v3, %v1571_v11 }
0x210b   :  { %1576 = vrot.lane.b32.xlu1 %v1573_v13, %s3054_s3 }
0x217d   :  { %v1577_v14 = vpop.permute.xlu1 %1576 }
0x217e   :  { %2556 = vmatmul.mubr.msk.f32.vlgmr.msra.gmra.mrb[14].mxu0 %vm227_vm2, %v1577_v14 }
0x217f   :  { %2714 = vmatpush3.bf16.msra.mxu0 %v3361_v50  ;;  %2577 = vmatprep.mubr.msk.f32.mxu0 %vm3051_vm0, %v3052_v1 }
0x2180   :  { %2715 = vmatprep.subr.bf16.mxu0 %v3050_v0 }
0x2183   :  { %2717 = vmatpush3.bf16.msra.mxu0 %v3368_v54 }
0x2184   :  { %2724 = vmatprep.subr.bf16.mxu0 %v3050_v0 }
0x2251   :  { %v1646_v16 = vpop.f32.mrb[14].mxu0 }
0x2252   :  { %v1650_v17 = vadd.f32 %v1646_v16, %v1574_v15  ;;  %v2557_v18 = vpop.f32.mrb[15].mxu0 }
0x2254   :  { %2846 = vtanh.f32 %v1650_v17  ;;  %v2283_v20 = vmul.f32 -1.442695, %v1650_v17 }
0x2256   :  { %2848 = vpow2.f32 %v2283_v20 }
0x225e   :  { %v2847_v19 = vpop.eup %2846 }
0x225f   :  { %1660 = vrot.lane.b32.xlu0 %v2847_v19, %s3053_s28 }
0x2260   :  { %v2849_v21 = vpop.eup %2848 }
0x2261   :  { %v1654_v22 = vadd.f32 1.0, %v2849_v21  ;;  %v1978_v21 = vld [vmem:[%s3515_s9] sm:$0xff] }
0x2263   :  { %2850 = vrcp.f32 %v1654_v22  ;;  %v1979_v22 = vld [vmem:[%s3515_s9 + $0x8] sm:$0xff] }
0x226d   :  { %v2851_v23 = vpop.eup %2850 }
0x226e   :  { %v1658_v26 = vmul.f32 %v2851_v23, %v1567_v9 }
0x22d1   :  { %v1661_v24 = vpop.permute.xlu0 %1660 }
0x22d2   :  { %v1663_v25 = vmul.f32 %v2851_v23, %v1661_v24  ;;  %v2725_v24 = vpack.c.bf16 %v1979_v22, %v1978_v21 }
0x22d4   :  { %1665 = vrot.lane.b32.xlu1 %v1663_v25, %s3054_s3  ;;  %v1981_v25 = vld [vmem:[%s3515_s9 + $0x18] sm:$0xff] }
0x2346   :  { %v1666_v27 = vpop.permute.xlu1 %1665 }
0x2347   :  { %v1668_v28 = vadd.f32 %v1666_v27, %v1658_v26 }
0x2349   :  { %2852 = vtanh.f32 %v1668_v28 }
0x2353   :  { %v2853_v29 = vpop.eup %2852 }
0x2354   :  { %1671 = vrot.lane.b32.xlu0 %v2853_v29, %s3053_s28 }
0x23c6   :  { %v1672_v30 = vpop.permute.xlu0 %1671 }
0x23c7   :  { %v1674_v31 = vmul.f32 %v2851_v23, %v1672_v30  ;;  %v1980_v23 = vld [vmem:[%s3515_s9 + $0x10] sm:$0xff] }
0x23c8   :  { %v2728_v26 = vpack.c.bf16 %v1981_v25, %v1980_v23 }
0x23c9   :  { %1677 = vrot.lane.b32.xlu1 %v1674_v31, %s3054_s3  ;;  %v2065_v31 = vld [vmem:[#allocation10] sm:$0xff] }
0x243b   :  { %v1678_v32 = vpop.permute.xlu1 %1677 }
0x243c   :  { %2567 = vmatmul.mubr.msk.f32.vlgmr.msra.gmra.mrb[14].mxu1 %vm227_vm2, %v1678_v32  ;;  %v2066_v32 = vld [vmem:[#allocation10 + $0x8] sm:$0xff] }
0x243d   :  { %2720 = vmatpush3.bf16.msra.mxu1 %v3361_v50  ;;  %2588 = vmatprep.mubr.msk.f32.mxu1 %vm3051_vm0, %v3052_v1 }
0x243e   :  { %2721 = vmatprep.subr.bf16.mxu1 %v3050_v0 }
0x2441   :  { %2723 = vmatpush3.bf16.msra.mxu1 %v3368_v54 }
0x2442   :  { %2730 = vmatprep.subr.bf16.mxu1 %v3050_v0 }
0x250f   :  { %v1747_v34 = vpop.f32.mrb[14].mxu1 }
0x2510   :  { %v1751_v35 = vadd.f32 %v1747_v34, %v1675_v33  ;;  %v2568_v36 = vpop.f32.mrb[15].mxu1  ;;  %v2731_v33 = vpack.c.bf16 %v2066_v32, %v2065_v31  ;;  %v2290_v34 = vld [vmem:[#allocation9] ss:$0 sm:$0xff] }
0x2512   :  { %2854 = vtanh.f32 %v1751_v35  ;;  %v2285_v38 = vmul.f32 -1.442695, %v1751_v35 }
0x2514   :  { %2856 = vpow2.f32 %v2285_v38  ;;  %v2148_v38 = vld [vmem:[%s3519_s13] sm:$0xff] }
0x251c   :  { %v2855_v37 = vpop.eup %2854 }
0x251d   :  { %1761 = vrot.lane.b32.xlu0 %v2855_v37, %s3053_s28 }
0x251e   :  { %v2857_v50 = vpop.eup %2856 }
0x251f   :  { %v1755_v39 = vadd.f32 1.0, %v2857_v50  ;;  %v2149_v50 = vld [vmem:[%s3519_s13 + $0x8] sm:$0xff] }
0x2521   :  { %2858 = vrcp.f32 %v1755_v39  ;;  %v2292_v39 = vld [vmem:[#allocation12] ss:$0 sm:$0xff] }
0x252b   :  { %v2859_v40 = vpop.eup %2858 }
0x252c   :  { %v1759_v54 = vmul.f32 %v2859_v40, %v1668_v28 }
0x258f   :  { %v1762_v41 = vpop.permute.xlu0 %1761 }
0x2590   :  { %v1764_v42 = vmul.f32 %v2859_v40, %v1762_v41 }
0x2592   :  { %1766 = vrot.lane.b32.xlu1 %v1764_v42, %s3054_s3 }
0x2604   :  { %v1767_v43 = vpop.permute.xlu1 %1766 }
0x2605   :  { %v1769_v44 = vadd.f32 %v1767_v43, %v1759_v54  ;;  %v2294_v43 = vld [vmem:[#allocation13] ss:$0 sm:$0xff] }
0x2607   :  { %2860 = vtanh.f32 %v1769_v44 }
0x2611   :  { %v2861_v45 = vpop.eup %2860 }
0x2612   :  { %1772 = vrot.lane.b32.xlu0 %v2861_v45, %s3053_s28 }
0x2684   :  { %v1773_v46 = vpop.permute.xlu0 %1772 }
0x2685   :  { %v1775_v47 = vmul.f32 %v2859_v40, %v1773_v46 }
0x2687   :  { %1778 = vrot.lane.b32.xlu1 %v1775_v47, %s3054_s3 }
0x26f9   :  { %v1779_v48 = vpop.permute.xlu1 %1778 }
0x26fa   :  { %2578 = vmatmul.mubr.msk.f32.vlgmr.msra.gmra.mrb[16].mxu0 %vm227_vm2, %v1779_v48 }
0x26fb   :  { %2599 = vmatprep.mubr.msk.f32.mxu0 %vm3051_vm0, %v3052_v1  ;;  %2726 = vmatpush3.bf16.msra.mxu0 %v2725_v24 }
0x26fc   :  { %2727 = vmatprep.subr.bf16.mxu0 %v3050_v0 }
0x26ff   :  { %2729 = vmatpush3.bf16.msra.mxu0 %v2728_v26 }
0x2700   :  { %2733 = vmatprep.subr.bf16.mxu0 %v3050_v0 }
0x27cd   :  { %v1848_v51 = vpop.f32.mrb[16].mxu0 }
0x27ce   :  { %v1852_v52 = vadd.f32 %v1848_v51, %v1776_v49  ;;  %v2579_v53 = vpop.f32.mrb[17].mxu0 }
0x27d0   :  { %2862 = vtanh.f32 %v1852_v52  ;;  %v2287_v56 = vmul.f32 -1.442695, %v1852_v52 }
0x27d2   :  { %2864 = vpow2.f32 %v2287_v56 }
0x27da   :  { %v2863_v55 = vpop.eup %2862 }
0x27db   :  { %1862 = vrot.lane.b32.xlu0 %v2863_v55, %s3053_s28 }
0x27dc   :  { %v2865_v8 = vpop.eup %2864 }
0x27dd   :  { %v1856_v57 = vadd.f32 1.0, %v2865_v8 }
0x27df   :  { %2866 = vrcp.f32 %v1856_v57 }
0x27e9   :  { %v2867_v58 = vpop.eup %2866 }
0x27ea   :  { %v1860_v12 = vmul.f32 %v2867_v58, %v1769_v44 }
0x284d   :  { %v1863_v59 = vpop.permute.xlu0 %1862 }
0x284e   :  { %v1865_v60 = vmul.f32 %v2867_v58, %v1863_v59 }
0x2850   :  { %1867 = vrot.lane.b32.xlu1 %v1865_v60, %s3054_s3 }
0x28c2   :  { %v1868_v61 = vpop.permute.xlu1 %1867 }
0x28c3   :  { %v1870_v62 = vadd.f32 %v1868_v61, %v1860_v12 }
0x28c5   :  { %2868 = vtanh.f32 %v1870_v62 }
0x28cf   :  { %v2869_v63 = vpop.eup %2868 }
0x28d0   :  { %1873 = vrot.lane.b32.xlu0 %v2869_v63, %s3053_s28 }
0x2942   :  { %v1874_v2 = vpop.permute.xlu0 %1873 }
0x2943   :  { %v1876_v3 = vmul.f32 %v2867_v58, %v1874_v2 }
0x2945   :  { %1879 = vrot.lane.b32.xlu1 %v1876_v3, %s3054_s3 }
0x29b7   :  { %v1880_v4 = vpop.permute.xlu1 %1879 }
0x29b8   :  { %2589 = vmatmul.mubr.msk.f32.vlgmr.msra.gmra.mrb[16].mxu1 %vm227_vm2, %v1880_v4 }
0x29b9   :  { %2606 = vmatprep.mubr.msk.f32.mxu1 %vm3051_vm0, %v3052_v1  ;;  %2732 = vmatpush3.bf16.msra.mxu1 %v2731_v33 }
0x2a8b   :  { %v1949_v6 = vpop.f32.mrb[16].mxu1 }
0x2a8c   :  { %v1953_v7 = vadd.f32 %v1949_v6, %v1877_v5  ;;  %v2590_v9 = vpop.f32.mrb[17].mxu1 }
0x2a8e   :  { %2870 = vtanh.f32 %v1953_v7  ;;  %v2289_v11 = vmul.f32 -1.442695, %v1953_v7 }
0x2a90   :  { %2872 = vpow2.f32 %v2289_v11 }
0x2a98   :  { %v2871_v10 = vpop.eup %2870 }
0x2a99   :  { %1963 = vrot.lane.b32.xlu0 %v2871_v10, %s3053_s28 }
0x2a9a   :  { %v2873_v13 = vpop.eup %2872 }
0x2a9b   :  { %v1957_v14 = vadd.f32 1.0, %v2873_v13 }
0x2a9d   :  { %2874 = vrcp.f32 %v1957_v14 }
0x2aa7   :  { %v2875_v15 = vpop.eup %2874 }
0x2aa8   :  { %v1961_v18 = vmul.f32 %v2875_v15, %v1870_v62 }
0x2b0b   :  { %v1964_v16 = vpop.permute.xlu0 %1963 }
0x2b0c   :  { %v1966_v17 = vmul.f32 %v2875_v15, %v1964_v16 }
0x2b0e   :  { %1968 = vrot.lane.b32.xlu1 %v1966_v17, %s3054_s3 }
0x2b80   :  { %v1969_v19 = vpop.permute.xlu1 %1968 }
0x2b81   :  { %v1971_v20 = vadd.f32 %v1969_v19, %v1961_v18 }
0x2b83   :  { %2876 = vtanh.f32 %v1971_v20 }
0x2b8d   :  { %v2877_v27 = vpop.eup %2876 }
0x2b8e   :  { %1974 = vrot.lane.b32.xlu0 %v2877_v27, %s3053_s28 }
0x2c00   :  { %v1975_v28 = vpop.permute.xlu0 %1974 }
0x2c01   :  { %v1977_v29 = vmul.f32 %v2875_v15, %v1975_v28 }
0x2c03   :  { %1990 = vrot.lane.b32.xlu1 %v1977_v29, %s3054_s3 }
0x2c75   :  { %v1991_v30 = vpop.permute.xlu1 %1990 }
0x2c76   :  { %2600 = vmatmul.mubr.msk.f32.vlgmr.msra.gmra.mrb[18].mxu0 %vm227_vm2, %v1991_v30 }
0x2c77   :  { %2613 = vmatprep.mubr.msk.f32.mxu0 %vm3051_vm0, %v3052_v1  ;;  %v2734_v1 = vpack.c.bf16 %v2149_v50, %v2148_v38 }
0x2c79   :  { %2735 = vmatpush3.bf16.msra.mxu0 %v2734_v1 }
0x2d49   :  { %v2060_v35 = vpop.f32.mrb[18].mxu0 }
0x2d4a   :  { %v2061_v0 = vadd.f32 %v2290_v34, %v2060_v35  ;;  %v2601_v36 = vpop.f32.mrb[19].mxu0 }
0x2d4c   :  { %v2064_v37 = vmax.f32 %v2061_v0, 0.0 }
0x2d4e   :  { %2607 = vmatmul.mubr.msk.f32.vlgmr.msra.gmra.mrb[18].mxu1 %vm136_vm1, %v2064_v37 }
0x2e21   :  { %v2143_v40 = vpop.f32.mrb[18].mxu1 }
0x2e22   :  { %v2144_v41 = vadd.f32 %v2292_v39, %v2143_v40  ;;  %v2608_v42 = vpop.f32.mrb[19].mxu1 }
0x2e24   :  { %v2147_v54 = vmax.f32 %v2144_v41, 0.0 }
0x2e26   :  { %2614 = vmatmul.mubr.msk.f32.vlgmr.msra.gmra.mrb[20].mxu0 %vm136_vm1, %v2147_v54 }
0x2ef9   :  { %v2226_v44 = vpop.f32.mrb[20].mxu0 }
0x2efa   :  { %v2227_v45 = vadd.f32 %v2294_v43, %v2226_v44  ;;  %v2615_v46 = vpop.f32.mrb[21].mxu0 }
0x2efc   :  { %2231 = vst.msk [vmem:[#allocation15] sm:$0x3] %vm2230_vm4, %v2227_v45 }
0x2efd   :  { %3021 = shalt.err (!%p3018_p10)
}
0x2efe   :  { %s3022_s18 = scalar_lea.hbm %s3521_s15, 32 }
0x2eff   :  { %p3023_p11 = scmp.ne.s32.totalorder %s3521_s15, %s3022_s18  ;;  %p3026_p12 = scmp.lt.u32.totalorder %s3022_s18, %s3521_s15 }
0x2f01   :  { %p3028_p13 = pnand %p3026_p12, %p3023_p11 }
0x2f03   :  { %3031 = shalt.err (!%p3028_p13)
}
0x2f04   :  { %2241 = dma.vmem_to_hbm [thread:$0]  %s2239_s29, 32, %s3521_s15, [#allocation6]  }
0x2f05   :  { %3040 = dma.done.wait [#allocation6], 32  }
0x2f06   :  { %3041 = vsyncadd [#allocation6], 4294967264 }
0x2f07   :  { %2245 = vsyncpa [#allocation5], 1 }
0x2f08   :  { %2246 = vsyncpa [#allocation8], 1 }
0x2f09   :  { %2247 = vsyncpa [#allocation11], 1 }
0x2f0a   :  { %2248 = vsyncpa [#allocation14], 1 }
0x2f0b   :  { %2249 = vsyncpa [#allocation6], 1 }

</bundles_post_ra>
